<compile_context>
chip_gen: v7x
topology: tpu7x:2x2x1
jax: 0.10.0
libtpu: 0.0.40
codegen_flags: <defaults>
</compile_context>

<pallas_src>
import jax
import jax.numpy as jnp
from jax.experimental import pallas as pl
from jax.experimental.pallas import tpu as pltpu


def _round_up(x, m):
    return (x + m - 1) // m * m


def _layer_meta(h, w, cin, cout, kh, kw, stride, padding):
    hp, wp = h + 2 * padding, w + 2 * padding
    ho = (hp - kh) // stride + 1
    wo = (wp - kw) // stride + 1
    cin_pad = _round_up(cin, 8)
    kp = kh * kw * cin_pad
    npanel = ho * wp  # panel length: Wp-period rows, junk tail columns per row
    pad_len = max(hp * wp,
                  (kh - 1) * wp + (kw - 1) + stride * (npanel - 1) + 1)
    return dict(Cin=cin, Cin_pad=cin_pad, Cout=cout, H=h, W=w, Hp=hp, Wp=wp,
                Ho=ho, Wo=wo, KH=kh, KW=kw, s=stride, p=padding,
                Kp=kp, Np=npanel, pad_len=pad_len)


def _make_conv_block_kernel(metas):
    """Fused kernel: per grid step (one batch element) run every conv+bias+ReLU
    layer back to back, keeping activations on chip."""
    L = len(metas)

    def kernel(*refs):
        x_ref = refs[0]                      # (1, Cin0, H0*W0) f32
        o_ref = refs[1 + 2 * L]              # (1, CoutL, HoL*WoL) f32
        scratch = refs[2 + 2 * L:]           # [pad0, patch0, pad1, patch1, ...]

        prev_act = None                      # (Cout_prev, Np_prev) f32, in-register
        prev_wp = None
        for l, m in enumerate(metas):
            w_ref = refs[1 + 2 * l]          # (Cout, Kp) bf16
            b_ref = refs[2 + 2 * l]          # (Cout, 1)  f32
            pad_ref = scratch[2 * l]         # (Cin, pad_len) f32
            patch_ref = scratch[2 * l + 1]   # (Kp, Np) f32

            Cin, Cin_pad, Cout = m["Cin"], m["Cin_pad"], m["Cout"]
            H, W, Wp = m["H"], m["W"], m["Wp"]
            Ho, Wo, KH, KW = m["Ho"], m["Wo"], m["KH"], m["KW"]
            s, p, Np = m["s"], m["p"], m["Np"]

            # Fresh zeros every grid step (scratch persists across iterations).
            pad_ref[...] = jnp.zeros_like(pad_ref)
            if Cin_pad != Cin:
                patch_ref[...] = jnp.zeros_like(patch_ref)

            # Scatter current activation rows into the flat zero-padded image.
            if l == 0:
                src = x_ref[0]               # (Cin, H*W)
                src_wp = W
            else:
                src = prev_act
                src_wp = prev_wp
            for h in range(H):
                dst = (h + p) * Wp + p
                pad_ref[:, dst:dst + W] = src[:, h * src_wp: h * src_wp + W]

            xp = pad_ref[...]                # (Cin, pad_len)

            # im2col: each kernel tap is a (strided) lane-slice of the flat image.
            for kh in range(KH):
                for kw in range(KW):
                    t = kh * KW + kw
                    base = kh * Wp + kw
                    panel = xp[:, base: base + s * (Np - 1) + 1: s]   # (Cin, Np)
                    patch_ref[t * Cin_pad: t * Cin_pad + Cin, :] = panel

            # One MXU matmul per layer (bf16 operands, f32 accumulation).
            patch = patch_ref[...].astype(jnp.bfloat16)               # (Kp, Np)
            acc = jnp.dot(w_ref[...], patch,
                          preferred_element_type=jnp.float32)        # (Cout, Np)
            act = jnp.maximum(acc + b_ref[...], 0.0)                  # bias + ReLU (f32)

            if l == L - 1:
                # Copy the valid columns of each Wp-period row into the
                # lane-dense (Cout, Ho*Wo) output block.
                for ho in range(Ho):
                    o_ref[0, :, ho * Wo:(ho + 1) * Wo] = \
                        act[:, ho * Wp: ho * Wp + Wo]
            else:
                prev_act, prev_wp = act, Wp

    return kernel


def conv_block_forward(x_nchw, params, *, stride, padding):
    """Equivalent of ConvBlock.forward (NCHW in / NCHW out), one pallas_call."""
    N, C, H, W = x_nchw.shape
    L = len(params)

    metas, w_mats, b_cols = [], [], []
    h, w_sp, c = H, W, C
    for (wt, bias) in params:
        cout, cin, kh, kw = wt.shape
        assert cin == c
        m = _layer_meta(h, w_sp, cin, cout, kh, kw, stride, padding)
        metas.append(m)
        # (Cout, Cin, KH, KW) -> (Cout, KH, KW, Cin_pad) -> (Cout, Kp), bf16.
        wm = jnp.transpose(wt, (0, 2, 3, 1))
        if m["Cin_pad"] != cin:
            wm = jnp.pad(wm, ((0, 0), (0, 0), (0, 0), (0, m["Cin_pad"] - cin)))
        w_mats.append(wm.reshape(cout, m["Kp"]).astype(jnp.bfloat16))
        b_cols.append(bias.reshape(cout, 1).astype(jnp.float32))
        h, w_sp, c = m["Ho"], m["Wo"], cout

    mL = metas[-1]

    in_specs = [pl.BlockSpec((1, C, H * W), lambda n: (n, 0, 0))]
    inputs = [x_nchw.reshape(N, C, H * W)]          # free bitcast reshape
    for l, m in enumerate(metas):
        in_specs.append(pl.BlockSpec((m["Cout"], m["Kp"]), lambda n: (0, 0)))
        in_specs.append(pl.BlockSpec((m["Cout"], 1), lambda n: (0, 0)))
        inputs.append(w_mats[l])
        inputs.append(b_cols[l])

    scratch_shapes = []
    for m in metas:
        scratch_shapes.append(pltpu.VMEM((m["Cin"], m["pad_len"]), jnp.float32))
        scratch_shapes.append(pltpu.VMEM((m["Kp"], m["Np"]), jnp.float32))

    out = pl.pallas_call(
        _make_conv_block_kernel(metas),
        out_shape=jax.ShapeDtypeStruct((N, mL["Cout"], mL["Ho"] * mL["Wo"]),
                                       jnp.float32),
        grid_spec=pltpu.PrefetchScalarGridSpec(
            num_scalar_prefetch=0,
            grid=(N,),
            in_specs=in_specs,
            out_specs=pl.BlockSpec((1, mL["Cout"], mL["Ho"] * mL["Wo"]),
                                   lambda n: (n, 0, 0)),
            scratch_shapes=scratch_shapes,
        ),
        compiler_params=pltpu.CompilerParams(
            dimension_semantics=("parallel",)),
    )(*inputs)

    # Free (bitcast) reshape back to NCHW.
    return out.reshape(N, mL["Cout"], mL["Ho"], mL["Wo"])


def init_conv_block_params(key, input_channels, num_conv, num_filters,
                           kernel_size):
    """Kaiming-normal (fan_in, relu) weights, zero bias — matches module init.
    Weights kept in the PyTorch (Cout, Cin, KH, KW) layout."""
    params = []
    in_c = input_channels
    for i in range(num_conv):
        out_c = num_filters[i]
        key, wkey = jax.random.split(key)
        fan_in = in_c * kernel_size * kernel_size
        std = (2.0 / fan_in) ** 0.5
        w = std * jax.random.normal(
            wkey, (out_c, in_c, kernel_size, kernel_size), dtype=jnp.float32)
        b = jnp.zeros((out_c,), dtype=jnp.float32)
        params.append((w, b))
        in_c = out_c
    return params


if __name__ == "__main__":
    batch = 2
    input_channels = 4
    num_conv = 2
    num_filters = [8, 8]
    kernel_size = 3
    stride = 1
    padding = 1
    H = W = 16

    key = jax.random.PRNGKey(0)
    key, xkey = jax.random.split(key)
    x = jax.random.normal(xkey, (batch, input_channels, H, W), dtype=jnp.float32)

    params = init_conv_block_params(key, input_channels, num_conv, num_filters,
                                    kernel_size)

    out = conv_block_forward(x, params, stride=stride, padding=padding)
    out = jax.block_until_ready(out)

    # Reference: same dataflow (bf16 matmul operands, f32 accumulation) via lax.conv.
    ref = x
    for (wt, b) in params:
        ref = jax.lax.conv_general_dilated(
            ref.astype(jnp.bfloat16), wt.astype(jnp.bfloat16),
            window_strides=(stride, stride),
            padding=((padding, padding), (padding, padding)),
            dimension_numbers=("NCHW", "OIHW", "NCHW"),
            preferred_element_type=jnp.float32)
        ref = jnp.maximum(ref + b.reshape(1, -1, 1, 1), 0.0)

    assert out.shape == (batch, num_filters[-1], H, W), out.shape
    max_err = float(jnp.max(jnp.abs(out - ref)))
    assert jnp.allclose(out, ref, atol=1e-2, rtol=1e-2), max_err

    print("KERNEL_OK")
</pallas_src>

<mosaic_0001>
module attributes {stable_mosaic.version = 11 : i64} {
  func.func @kernel(%arg0: i32, %arg1: memref<1x4x256xf32, #tpu.memory_space<vmem>>, %arg2: memref<8x72xbf16, #tpu.memory_space<vmem>>, %arg3: memref<8x1xf32, #tpu.memory_space<vmem>>, %arg4: memref<8x72xbf16, #tpu.memory_space<vmem>>, %arg5: memref<8x1xf32, #tpu.memory_space<vmem>>, %arg6: memref<1x8x256xf32, #tpu.memory_space<vmem>>, %arg7: memref<4x326xf32, #tpu.memory_space<vmem>>, %arg8: memref<72x288xf32, #tpu.memory_space<vmem>>, %arg9: memref<8x326xf32, #tpu.memory_space<vmem>>, %arg10: memref<72x288xf32, #tpu.memory_space<vmem>>) attributes {dimension_semantics = [#tpu.dimension_semantics<parallel>], iteration_bounds = array<i64: 2>, scalar_prefetch = 0 : i64, scratch_operands = 4 : i64, tpu.core_type = #tpu.core_type<tc>, window_params = [{transform_indices = @transform_0, window_bounds = array<i64: 1, 4, 256>}, {pipeline_mode = #tpu.pipeline_mode<synchronous>, transform_indices = @transform_1, window_bounds = array<i64: 8, 72>}, {pipeline_mode = #tpu.pipeline_mode<synchronous>, transform_indices = @transform_2, window_bounds = array<i64: 8, 1>}, {pipeline_mode = #tpu.pipeline_mode<synchronous>, transform_indices = @transform_3, window_bounds = array<i64: 8, 72>}, {pipeline_mode = #tpu.pipeline_mode<synchronous>, transform_indices = @transform_4, window_bounds = array<i64: 8, 1>}, {transform_indices = @transform_5, window_bounds = array<i64: 1, 8, 256>}]} {
    %cst = arith.constant 0.000000e+00 : f32
    %0 = vector.broadcast %cst : f32 to vector<4x326xf32>
    %c0 = arith.constant 0 : index
    %c0_0 = arith.constant 0 : index
    %1 = vector.load %arg7[%c0, %c0_0] : memref<4x326xf32, #tpu.memory_space<vmem>>, vector<4x326xf32>
    tpu.vector_store %arg7[%c0, %c0_0], %0 {strides = array<i32>} : memref<4x326xf32, #tpu.memory_space<vmem>>, vector<4x326xf32>,
    %cst_1 = arith.constant 0.000000e+00 : f32
    %2 = vector.broadcast %cst_1 : f32 to vector<72x288xf32>
    %c0_2 = arith.constant 0 : index
    %c0_3 = arith.constant 0 : index
    %3 = vector.load %arg8[%c0_2, %c0_3] : memref<72x288xf32, #tpu.memory_space<vmem>>, vector<72x288xf32>
    tpu.vector_store %arg8[%c0_2, %c0_3], %2 {strides = array<i32>} : memref<72x288xf32, #tpu.memory_space<vmem>>, vector<72x288xf32>,
    %c0_4 = arith.constant 0 : index
    %c0_5 = arith.constant 0 : index
    %c0_6 = arith.constant 0 : index
    %4 = vector.load %arg1[%c0_4, %c0_5, %c0_6] : memref<1x4x256xf32, #tpu.memory_space<vmem>>, vector<1x4x256xf32>
    %5 = vector.shape_cast %4 : vector<1x4x256xf32> to vector<4x256xf32>
    %6 = vector.extract_strided_slice %5 {offsets = [0, 0], sizes = [4, 16], strides = [1, 1]} : vector<4x256xf32> to vector<4x16xf32>
    %c0_7 = arith.constant 0 : index
    %c19 = arith.constant 19 : index
    %7 = vector.load %arg7[%c0_7, %c19] : memref<4x326xf32, #tpu.memory_space<vmem>>, vector<4x16xf32>
    tpu.vector_store %arg7[%c0_7, %c19], %6 {strides = array<i32>} : memref<4x326xf32, #tpu.memory_space<vmem>>, vector<4x16xf32>,
    %8 = vector.extract_strided_slice %5 {offsets = [0, 16], sizes = [4, 16], strides = [1, 1]} : vector<4x256xf32> to vector<4x16xf32>
    %c0_8 = arith.constant 0 : index
    %c37 = arith.constant 37 : index
    %9 = vector.load %arg7[%c0_8, %c37] : memref<4x326xf32, #tpu.memory_space<vmem>>, vector<4x16xf32>
    tpu.vector_store %arg7[%c0_8, %c37], %8 {strides = array<i32>} : memref<4x326xf32, #tpu.memory_space<vmem>>, vector<4x16xf32>,
    %10 = vector.extract_strided_slice %5 {offsets = [0, 32], sizes = [4, 16], strides = [1, 1]} : vector<4x256xf32> to vector<4x16xf32>
    %c0_9 = arith.constant 0 : index
    %c55 = arith.constant 55 : index
    %11 = vector.load %arg7[%c0_9, %c55] : memref<4x326xf32, #tpu.memory_space<vmem>>, vector<4x16xf32>
    tpu.vector_store %arg7[%c0_9, %c55], %10 {strides = array<i32>} : memref<4x326xf32, #tpu.memory_space<vmem>>, vector<4x16xf32>,
    %12 = vector.extract_strided_slice %5 {offsets = [0, 48], sizes = [4, 16], strides = [1, 1]} : vector<4x256xf32> to vector<4x16xf32>
    %c0_10 = arith.constant 0 : index
    %c73 = arith.constant 73 : index
    %13 = vector.load %arg7[%c0_10, %c73] : memref<4x326xf32, #tpu.memory_space<vmem>>, vector<4x16xf32>
    tpu.vector_store %arg7[%c0_10, %c73], %12 {strides = array<i32>} : memref<4x326xf32, #tpu.memory_space<vmem>>, vector<4x16xf32>,
    %14 = vector.extract_strided_slice %5 {offsets = [0, 64], sizes = [4, 16], strides = [1, 1]} : vector<4x256xf32> to vector<4x16xf32>
    %c0_11 = arith.constant 0 : index
    %c91 = arith.constant 91 : index
    %15 = vector.load %arg7[%c0_11, %c91] : memref<4x326xf32, #tpu.memory_space<vmem>>, vector<4x16xf32>
    tpu.vector_store %arg7[%c0_11, %c91], %14 {strides = array<i32>} : memref<4x326xf32, #tpu.memory_space<vmem>>, vector<4x16xf32>,
    %16 = vector.extract_strided_slice %5 {offsets = [0, 80], sizes = [4, 16], strides = [1, 1]} : vector<4x256xf32> to vector<4x16xf32>
    %c0_12 = arith.constant 0 : index
    %c109 = arith.constant 109 : index
    %17 = vector.load %arg7[%c0_12, %c109] : memref<4x326xf32, #tpu.memory_space<vmem>>, vector<4x16xf32>
    tpu.vector_store %arg7[%c0_12, %c109], %16 {strides = array<i32>} : memref<4x326xf32, #tpu.memory_space<vmem>>, vector<4x16xf32>,
    %18 = vector.extract_strided_slice %5 {offsets = [0, 96], sizes = [4, 16], strides = [1, 1]} : vector<4x256xf32> to vector<4x16xf32>
    %c0_13 = arith.constant 0 : index
    %c127 = arith.constant 127 : index
    %19 = vector.load %arg7[%c0_13, %c127] : memref<4x326xf32, #tpu.memory_space<vmem>>, vector<4x16xf32>
    tpu.vector_store %arg7[%c0_13, %c127], %18 {strides = array<i32>} : memref<4x326xf32, #tpu.memory_space<vmem>>, vector<4x16xf32>,
    %20 = vector.extract_strided_slice %5 {offsets = [0, 112], sizes = [4, 16], strides = [1, 1]} : vector<4x256xf32> to vector<4x16xf32>
    %c0_14 = arith.constant 0 : index
    %c145 = arith.constant 145 : index
    %21 = vector.load %arg7[%c0_14, %c145] : memref<4x326xf32, #tpu.memory_space<vmem>>, vector<4x16xf32>
    tpu.vector_store %arg7[%c0_14, %c145], %20 {strides = array<i32>} : memref<4x326xf32, #tpu.memory_space<vmem>>, vector<4x16xf32>,
    %22 = vector.extract_strided_slice %5 {offsets = [0, 128], sizes = [4, 16], strides = [1, 1]} : vector<4x256xf32> to vector<4x16xf32>
    %c0_15 = arith.constant 0 : index
    %c163 = arith.constant 163 : index
    %23 = vector.load %arg7[%c0_15, %c163] : memref<4x326xf32, #tpu.memory_space<vmem>>, vector<4x16xf32>
    tpu.vector_store %arg7[%c0_15, %c163], %22 {strides = array<i32>} : memref<4x326xf32, #tpu.memory_space<vmem>>, vector<4x16xf32>,
    %24 = vector.extract_strided_slice %5 {offsets = [0, 144], sizes = [4, 16], strides = [1, 1]} : vector<4x256xf32> to vector<4x16xf32>
    %c0_16 = arith.constant 0 : index
    %c181 = arith.constant 181 : index
    %25 = vector.load %arg7[%c0_16, %c181] : memref<4x326xf32, #tpu.memory_space<vmem>>, vector<4x16xf32>
    tpu.vector_store %arg7[%c0_16, %c181], %24 {strides = array<i32>} : memref<4x326xf32, #tpu.memory_space<vmem>>, vector<4x16xf32>,
    %26 = vector.extract_strided_slice %5 {offsets = [0, 160], sizes = [4, 16], strides = [1, 1]} : vector<4x256xf32> to vector<4x16xf32>
    %c0_17 = arith.constant 0 : index
    %c199 = arith.constant 199 : index
    %27 = vector.load %arg7[%c0_17, %c199] : memref<4x326xf32, #tpu.memory_space<vmem>>, vector<4x16xf32>
    tpu.vector_store %arg7[%c0_17, %c199], %26 {strides = array<i32>} : memref<4x326xf32, #tpu.memory_space<vmem>>, vector<4x16xf32>,
    %28 = vector.extract_strided_slice %5 {offsets = [0, 176], sizes = [4, 16], strides = [1, 1]} : vector<4x256xf32> to vector<4x16xf32>
    %c0_18 = arith.constant 0 : index
    %c217 = arith.constant 217 : index
    %29 = vector.load %arg7[%c0_18, %c217] : memref<4x326xf32, #tpu.memory_space<vmem>>, vector<4x16xf32>
    tpu.vector_store %arg7[%c0_18, %c217], %28 {strides = array<i32>} : memref<4x326xf32, #tpu.memory_space<vmem>>, vector<4x16xf32>,
    %30 = vector.extract_strided_slice %5 {offsets = [0, 192], sizes = [4, 16], strides = [1, 1]} : vector<4x256xf32> to vector<4x16xf32>
    %c0_19 = arith.constant 0 : index
    %c235 = arith.constant 235 : index
    %31 = vector.load %arg7[%c0_19, %c235] : memref<4x326xf32, #tpu.memory_space<vmem>>, vector<4x16xf32>
    tpu.vector_store %arg7[%c0_19, %c235], %30 {strides = array<i32>} : memref<4x326xf32, #tpu.memory_space<vmem>>, vector<4x16xf32>,
    %32 = vector.extract_strided_slice %5 {offsets = [0, 208], sizes = [4, 16], strides = [1, 1]} : vector<4x256xf32> to vector<4x16xf32>
    %c0_20 = arith.constant 0 : index
    %c253 = arith.constant 253 : index
    %33 = vector.load %arg7[%c0_20, %c253] : memref<4x326xf32, #tpu.memory_space<vmem>>, vector<4x16xf32>
    tpu.vector_store %arg7[%c0_20, %c253], %32 {strides = array<i32>} : memref<4x326xf32, #tpu.memory_space<vmem>>, vector<4x16xf32>,
    %34 = vector.extract_strided_slice %5 {offsets = [0, 224], sizes = [4, 16], strides = [1, 1]} : vector<4x256xf32> to vector<4x16xf32>
    %c0_21 = arith.constant 0 : index
    %c271 = arith.constant 271 : index
    %35 = vector.load %arg7[%c0_21, %c271] : memref<4x326xf32, #tpu.memory_space<vmem>>, vector<4x16xf32>
    tpu.vector_store %arg7[%c0_21, %c271], %34 {strides = array<i32>} : memref<4x326xf32, #tpu.memory_space<vmem>>, vector<4x16xf32>,
    %36 = vector.extract_strided_slice %5 {offsets = [0, 240], sizes = [4, 16], strides = [1, 1]} : vector<4x256xf32> to vector<4x16xf32>
    %c0_22 = arith.constant 0 : index
    %c289 = arith.constant 289 : index
    %37 = vector.load %arg7[%c0_22, %c289] : memref<4x326xf32, #tpu.memory_space<vmem>>, vector<4x16xf32>
    tpu.vector_store %arg7[%c0_22, %c289], %36 {strides = array<i32>} : memref<4x326xf32, #tpu.memory_space<vmem>>, vector<4x16xf32>,
    %c0_23 = arith.constant 0 : index
    %c0_24 = arith.constant 0 : index
    %38 = vector.load %arg7[%c0_23, %c0_24] : memref<4x326xf32, #tpu.memory_space<vmem>>, vector<4x326xf32>
    %39 = vector.extract_strided_slice %38 {offsets = [0, 0], sizes = [4, 288], strides = [1, 1]} : vector<4x326xf32> to vector<4x288xf32>
    %c0_25 = arith.constant 0 : index
    %c0_26 = arith.constant 0 : index
    %40 = vector.load %arg8[%c0_25, %c0_26] : memref<72x288xf32, #tpu.memory_space<vmem>>, vector<4x288xf32>
    tpu.vector_store %arg8[%c0_25, %c0_26], %39 {strides = array<i32>} : memref<72x288xf32, #tpu.memory_space<vmem>>, vector<4x288xf32>,
    %41 = vector.extract_strided_slice %38 {offsets = [0, 1], sizes = [4, 288], strides = [1, 1]} : vector<4x326xf32> to vector<4x288xf32>
    %c8 = arith.constant 8 : index
    %c0_27 = arith.constant 0 : index
    %42 = vector.load %arg8[%c8, %c0_27] : memref<72x288xf32, #tpu.memory_space<vmem>>, vector<4x288xf32>
    tpu.vector_store %arg8[%c8, %c0_27], %41 {strides = array<i32>} : memref<72x288xf32, #tpu.memory_space<vmem>>, vector<4x288xf32>,
    %43 = vector.extract_strided_slice %38 {offsets = [0, 2], sizes = [4, 288], strides = [1, 1]} : vector<4x326xf32> to vector<4x288xf32>
    %c16 = arith.constant 16 : index
    %c0_28 = arith.constant 0 : index
    %44 = vector.load %arg8[%c16, %c0_28] : memref<72x288xf32, #tpu.memory_space<vmem>>, vector<4x288xf32>
    tpu.vector_store %arg8[%c16, %c0_28], %43 {strides = array<i32>} : memref<72x288xf32, #tpu.memory_space<vmem>>, vector<4x288xf32>,
    %45 = vector.extract_strided_slice %38 {offsets = [0, 18], sizes = [4, 288], strides = [1, 1]} : vector<4x326xf32> to vector<4x288xf32>
    %c24 = arith.constant 24 : index
    %c0_29 = arith.constant 0 : index
    %46 = vector.load %arg8[%c24, %c0_29] : memref<72x288xf32, #tpu.memory_space<vmem>>, vector<4x288xf32>
    tpu.vector_store %arg8[%c24, %c0_29], %45 {strides = array<i32>} : memref<72x288xf32, #tpu.memory_space<vmem>>, vector<4x288xf32>,
    %47 = vector.extract_strided_slice %38 {offsets = [0, 19], sizes = [4, 288], strides = [1, 1]} : vector<4x326xf32> to vector<4x288xf32>
    %c32 = arith.constant 32 : index
    %c0_30 = arith.constant 0 : index
    %48 = vector.load %arg8[%c32, %c0_30] : memref<72x288xf32, #tpu.memory_space<vmem>>, vector<4x288xf32>
    tpu.vector_store %arg8[%c32, %c0_30], %47 {strides = array<i32>} : memref<72x288xf32, #tpu.memory_space<vmem>>, vector<4x288xf32>,
    %49 = vector.extract_strided_slice %38 {offsets = [0, 20], sizes = [4, 288], strides = [1, 1]} : vector<4x326xf32> to vector<4x288xf32>
    %c40 = arith.constant 40 : index
    %c0_31 = arith.constant 0 : index
    %50 = vector.load %arg8[%c40, %c0_31] : memref<72x288xf32, #tpu.memory_space<vmem>>, vector<4x288xf32>
    tpu.vector_store %arg8[%c40, %c0_31], %49 {strides = array<i32>} : memref<72x288xf32, #tpu.memory_space<vmem>>, vector<4x288xf32>,
    %51 = vector.extract_strided_slice %38 {offsets = [0, 36], sizes = [4, 288], strides = [1, 1]} : vector<4x326xf32> to vector<4x288xf32>
    %c48 = arith.constant 48 : index
    %c0_32 = arith.constant 0 : index
    %52 = vector.load %arg8[%c48, %c0_32] : memref<72x288xf32, #tpu.memory_space<vmem>>, vector<4x288xf32>
    tpu.vector_store %arg8[%c48, %c0_32], %51 {strides = array<i32>} : memref<72x288xf32, #tpu.memory_space<vmem>>, vector<4x288xf32>,
    %53 = vector.extract_strided_slice %38 {offsets = [0, 37], sizes = [4, 288], strides = [1, 1]} : vector<4x326xf32> to vector<4x288xf32>
    %c56 = arith.constant 56 : index
    %c0_33 = arith.constant 0 : index
    %54 = vector.load %arg8[%c56, %c0_33] : memref<72x288xf32, #tpu.memory_space<vmem>>, vector<4x288xf32>
    tpu.vector_store %arg8[%c56, %c0_33], %53 {strides = array<i32>} : memref<72x288xf32, #tpu.memory_space<vmem>>, vector<4x288xf32>,
    %55 = vector.extract_strided_slice %38 {offsets = [0, 38], sizes = [4, 288], strides = [1, 1]} : vector<4x326xf32> to vector<4x288xf32>
    %c64 = arith.constant 64 : index
    %c0_34 = arith.constant 0 : index
    %56 = vector.load %arg8[%c64, %c0_34] : memref<72x288xf32, #tpu.memory_space<vmem>>, vector<4x288xf32>
    tpu.vector_store %arg8[%c64, %c0_34], %55 {strides = array<i32>} : memref<72x288xf32, #tpu.memory_space<vmem>>, vector<4x288xf32>,
    %c0_35 = arith.constant 0 : index
    %c0_36 = arith.constant 0 : index
    %57 = vector.load %arg8[%c0_35, %c0_36] : memref<72x288xf32, #tpu.memory_space<vmem>>, vector<72x288xf32>
    %58 = arith.truncf %57 : vector<72x288xf32> to vector<72x288xbf16>
    %c0_37 = arith.constant 0 : index
    %c0_38 = arith.constant 0 : index
    %59 = vector.load %arg2[%c0_37, %c0_38] : memref<8x72xbf16, #tpu.memory_space<vmem>>, vector<8x72xbf16>
    %cst_39 = arith.constant dense<0.000000e+00> : vector<8x288xf32>
    %60 = tpu.matmul %59, %58, %cst_39 {dimension_numbers = #tpu.dot_dimension_numbers<[1], [0], [0], [1], [0, 0, 1, 1], [], []>} : vector<8x72xbf16>, vector<72x288xbf16>, vector<8x288xf32> -> vector<8x288xf32>
    %c0_40 = arith.constant 0 : index
    %c0_41 = arith.constant 0 : index
    %61 = vector.load %arg3[%c0_40, %c0_41] : memref<8x1xf32, #tpu.memory_space<vmem>>, vector<8x1xf32>
    %62 = vector.broadcast %61 : vector<8x1xf32> to vector<8x288xf32>
    %63 = arith.addf %60, %62 : vector<8x288xf32>
    %cst_42 = arith.constant 0.000000e+00 : f32
    %64 = vector.broadcast %cst_42 : f32 to vector<8x288xf32>
    %65 = arith.maximumf %63, %64 : vector<8x288xf32>
    %cst_43 = arith.constant 0.000000e+00 : f32
    %66 = vector.broadcast %cst_43 : f32 to vector<8x326xf32>
    %c0_44 = arith.constant 0 : index
    %c0_45 = arith.constant 0 : index
    %67 = vector.load %arg9[%c0_44, %c0_45] : memref<8x326xf32, #tpu.memory_space<vmem>>, vector<8x326xf32>
    tpu.vector_store %arg9[%c0_44, %c0_45], %66 {strides = array<i32>} : memref<8x326xf32, #tpu.memory_space<vmem>>, vector<8x326xf32>,
    %68 = vector.extract_strided_slice %65 {offsets = [0, 0], sizes = [8, 16], strides = [1, 1]} : vector<8x288xf32> to vector<8x16xf32>
    %c0_46 = arith.constant 0 : index
    %c19_47 = arith.constant 19 : index
    %69 = vector.load %arg9[%c0_46, %c19_47] : memref<8x326xf32, #tpu.memory_space<vmem>>, vector<8x16xf32>
    tpu.vector_store %arg9[%c0_46, %c19_47], %68 {strides = array<i32>} : memref<8x326xf32, #tpu.memory_space<vmem>>, vector<8x16xf32>,
    %70 = vector.extract_strided_slice %65 {offsets = [0, 18], sizes = [8, 16], strides = [1, 1]} : vector<8x288xf32> to vector<8x16xf32>
    %c0_48 = arith.constant 0 : index
    %c37_49 = arith.constant 37 : index
    %71 = vector.load %arg9[%c0_48, %c37_49] : memref<8x326xf32, #tpu.memory_space<vmem>>, vector<8x16xf32>
    tpu.vector_store %arg9[%c0_48, %c37_49], %70 {strides = array<i32>} : memref<8x326xf32, #tpu.memory_space<vmem>>, vector<8x16xf32>,
    %72 = vector.extract_strided_slice %65 {offsets = [0, 36], sizes = [8, 16], strides = [1, 1]} : vector<8x288xf32> to vector<8x16xf32>
    %c0_50 = arith.constant 0 : index
    %c55_51 = arith.constant 55 : index
    %73 = vector.load %arg9[%c0_50, %c55_51] : memref<8x326xf32, #tpu.memory_space<vmem>>, vector<8x16xf32>
    tpu.vector_store %arg9[%c0_50, %c55_51], %72 {strides = array<i32>} : memref<8x326xf32, #tpu.memory_space<vmem>>, vector<8x16xf32>,
    %74 = vector.extract_strided_slice %65 {offsets = [0, 54], sizes = [8, 16], strides = [1, 1]} : vector<8x288xf32> to vector<8x16xf32>
    %c0_52 = arith.constant 0 : index
    %c73_53 = arith.constant 73 : index
    %75 = vector.load %arg9[%c0_52, %c73_53] : memref<8x326xf32, #tpu.memory_space<vmem>>, vector<8x16xf32>
    tpu.vector_store %arg9[%c0_52, %c73_53], %74 {strides = array<i32>} : memref<8x326xf32, #tpu.memory_space<vmem>>, vector<8x16xf32>,
    %76 = vector.extract_strided_slice %65 {offsets = [0, 72], sizes = [8, 16], strides = [1, 1]} : vector<8x288xf32> to vector<8x16xf32>
    %c0_54 = arith.constant 0 : index
    %c91_55 = arith.constant 91 : index
    %77 = vector.load %arg9[%c0_54, %c91_55] : memref<8x326xf32, #tpu.memory_space<vmem>>, vector<8x16xf32>
    tpu.vector_store %arg9[%c0_54, %c91_55], %76 {strides = array<i32>} : memref<8x326xf32, #tpu.memory_space<vmem>>, vector<8x16xf32>,
    %78 = vector.extract_strided_slice %65 {offsets = [0, 90], sizes = [8, 16], strides = [1, 1]} : vector<8x288xf32> to vector<8x16xf32>
    %c0_56 = arith.constant 0 : index
    %c109_57 = arith.constant 109 : index
    %79 = vector.load %arg9[%c0_56, %c109_57] : memref<8x326xf32, #tpu.memory_space<vmem>>, vector<8x16xf32>
    tpu.vector_store %arg9[%c0_56, %c109_57], %78 {strides = array<i32>} : memref<8x326xf32, #tpu.memory_space<vmem>>, vector<8x16xf32>,
    %80 = vector.extract_strided_slice %65 {offsets = [0, 108], sizes = [8, 16], strides = [1, 1]} : vector<8x288xf32> to vector<8x16xf32>
    %c0_58 = arith.constant 0 : index
    %c127_59 = arith.constant 127 : index
    %81 = vector.load %arg9[%c0_58, %c127_59] : memref<8x326xf32, #tpu.memory_space<vmem>>, vector<8x16xf32>
    tpu.vector_store %arg9[%c0_58, %c127_59], %80 {strides = array<i32>} : memref<8x326xf32, #tpu.memory_space<vmem>>, vector<8x16xf32>,
    %82 = vector.extract_strided_slice %65 {offsets = [0, 126], sizes = [8, 16], strides = [1, 1]} : vector<8x288xf32> to vector<8x16xf32>
    %c0_60 = arith.constant 0 : index
    %c145_61 = arith.constant 145 : index
    %83 = vector.load %arg9[%c0_60, %c145_61] : memref<8x326xf32, #tpu.memory_space<vmem>>, vector<8x16xf32>
    tpu.vector_store %arg9[%c0_60, %c145_61], %82 {strides = array<i32>} : memref<8x326xf32, #tpu.memory_space<vmem>>, vector<8x16xf32>,
    %84 = vector.extract_strided_slice %65 {offsets = [0, 144], sizes = [8, 16], strides = [1, 1]} : vector<8x288xf32> to vector<8x16xf32>
    %c0_62 = arith.constant 0 : index
    %c163_63 = arith.constant 163 : index
    %85 = vector.load %arg9[%c0_62, %c163_63] : memref<8x326xf32, #tpu.memory_space<vmem>>, vector<8x16xf32>
    tpu.vector_store %arg9[%c0_62, %c163_63], %84 {strides = array<i32>} : memref<8x326xf32, #tpu.memory_space<vmem>>, vector<8x16xf32>,
    %86 = vector.extract_strided_slice %65 {offsets = [0, 162], sizes = [8, 16], strides = [1, 1]} : vector<8x288xf32> to vector<8x16xf32>
    %c0_64 = arith.constant 0 : index
    %c181_65 = arith.constant 181 : index
    %87 = vector.load %arg9[%c0_64, %c181_65] : memref<8x326xf32, #tpu.memory_space<vmem>>, vector<8x16xf32>
    tpu.vector_store %arg9[%c0_64, %c181_65], %86 {strides = array<i32>} : memref<8x326xf32, #tpu.memory_space<vmem>>, vector<8x16xf32>,
    %88 = vector.extract_strided_slice %65 {offsets = [0, 180], sizes = [8, 16], strides = [1, 1]} : vector<8x288xf32> to vector<8x16xf32>
    %c0_66 = arith.constant 0 : index
    %c199_67 = arith.constant 199 : index
    %89 = vector.load %arg9[%c0_66, %c199_67] : memref<8x326xf32, #tpu.memory_space<vmem>>, vector<8x16xf32>
    tpu.vector_store %arg9[%c0_66, %c199_67], %88 {strides = array<i32>} : memref<8x326xf32, #tpu.memory_space<vmem>>, vector<8x16xf32>,
    %90 = vector.extract_strided_slice %65 {offsets = [0, 198], sizes = [8, 16], strides = [1, 1]} : vector<8x288xf32> to vector<8x16xf32>
    %c0_68 = arith.constant 0 : index
    %c217_69 = arith.constant 217 : index
    %91 = vector.load %arg9[%c0_68, %c217_69] : memref<8x326xf32, #tpu.memory_space<vmem>>, vector<8x16xf32>
    tpu.vector_store %arg9[%c0_68, %c217_69], %90 {strides = array<i32>} : memref<8x326xf32, #tpu.memory_space<vmem>>, vector<8x16xf32>,
    %92 = vector.extract_strided_slice %65 {offsets = [0, 216], sizes = [8, 16], strides = [1, 1]} : vector<8x288xf32> to vector<8x16xf32>
    %c0_70 = arith.constant 0 : index
    %c235_71 = arith.constant 235 : index
    %93 = vector.load %arg9[%c0_70, %c235_71] : memref<8x326xf32, #tpu.memory_space<vmem>>, vector<8x16xf32>
    tpu.vector_store %arg9[%c0_70, %c235_71], %92 {strides = array<i32>} : memref<8x326xf32, #tpu.memory_space<vmem>>, vector<8x16xf32>,
    %94 = vector.extract_strided_slice %65 {offsets = [0, 234], sizes = [8, 16], strides = [1, 1]} : vector<8x288xf32> to vector<8x16xf32>
    %c0_72 = arith.constant 0 : index
    %c253_73 = arith.constant 253 : index
    %95 = vector.load %arg9[%c0_72, %c253_73] : memref<8x326xf32, #tpu.memory_space<vmem>>, vector<8x16xf32>
    tpu.vector_store %arg9[%c0_72, %c253_73], %94 {strides = array<i32>} : memref<8x326xf32, #tpu.memory_space<vmem>>, vector<8x16xf32>,
    %96 = vector.extract_strided_slice %65 {offsets = [0, 252], sizes = [8, 16], strides = [1, 1]} : vector<8x288xf32> to vector<8x16xf32>
    %c0_74 = arith.constant 0 : index
    %c271_75 = arith.constant 271 : index
    %97 = vector.load %arg9[%c0_74, %c271_75] : memref<8x326xf32, #tpu.memory_space<vmem>>, vector<8x16xf32>
    tpu.vector_store %arg9[%c0_74, %c271_75], %96 {strides = array<i32>} : memref<8x326xf32, #tpu.memory_space<vmem>>, vector<8x16xf32>,
    %98 = vector.extract_strided_slice %65 {offsets = [0, 270], sizes = [8, 16], strides = [1, 1]} : vector<8x288xf32> to vector<8x16xf32>
    %c0_76 = arith.constant 0 : index
    %c289_77 = arith.constant 289 : index
    %99 = vector.load %arg9[%c0_76, %c289_77] : memref<8x326xf32, #tpu.memory_space<vmem>>, vector<8x16xf32>
    tpu.vector_store %arg9[%c0_76, %c289_77], %98 {strides = array<i32>} : memref<8x326xf32, #tpu.memory_space<vmem>>, vector<8x16xf32>,
    %c0_78 = arith.constant 0 : index
    %c0_79 = arith.constant 0 : index
    %100 = vector.load %arg9[%c0_78, %c0_79] : memref<8x326xf32, #tpu.memory_space<vmem>>, vector<8x326xf32>
    %101 = vector.extract_strided_slice %100 {offsets = [0, 0], sizes = [8, 288], strides = [1, 1]} : vector<8x326xf32> to vector<8x288xf32>
    %c0_80 = arith.constant 0 : index
    %c0_81 = arith.constant 0 : index
    %102 = vector.load %arg10[%c0_80, %c0_81] : memref<72x288xf32, #tpu.memory_space<vmem>>, vector<8x288xf32>
    tpu.vector_store %arg10[%c0_80, %c0_81], %101 {strides = array<i32>} : memref<72x288xf32, #tpu.memory_space<vmem>>, vector<8x288xf32>,
    %103 = vector.extract_strided_slice %100 {offsets = [0, 1], sizes = [8, 288], strides = [1, 1]} : vector<8x326xf32> to vector<8x288xf32>
    %c8_82 = arith.constant 8 : index
    %c0_83 = arith.constant 0 : index
    %104 = vector.load %arg10[%c8_82, %c0_83] : memref<72x288xf32, #tpu.memory_space<vmem>>, vector<8x288xf32>
    tpu.vector_store %arg10[%c8_82, %c0_83], %103 {strides = array<i32>} : memref<72x288xf32, #tpu.memory_space<vmem>>, vector<8x288xf32>,
    %105 = vector.extract_strided_slice %100 {offsets = [0, 2], sizes = [8, 288], strides = [1, 1]} : vector<8x326xf32> to vector<8x288xf32>
    %c16_84 = arith.constant 16 : index
    %c0_85 = arith.constant 0 : index
    %106 = vector.load %arg10[%c16_84, %c0_85] : memref<72x288xf32, #tpu.memory_space<vmem>>, vector<8x288xf32>
    tpu.vector_store %arg10[%c16_84, %c0_85], %105 {strides = array<i32>} : memref<72x288xf32, #tpu.memory_space<vmem>>, vector<8x288xf32>,
    %107 = vector.extract_strided_slice %100 {offsets = [0, 18], sizes = [8, 288], strides = [1, 1]} : vector<8x326xf32> to vector<8x288xf32>
    %c24_86 = arith.constant 24 : index
    %c0_87 = arith.constant 0 : index
    %108 = vector.load %arg10[%c24_86, %c0_87] : memref<72x288xf32, #tpu.memory_space<vmem>>, vector<8x288xf32>
    tpu.vector_store %arg10[%c24_86, %c0_87], %107 {strides = array<i32>} : memref<72x288xf32, #tpu.memory_space<vmem>>, vector<8x288xf32>,
    %109 = vector.extract_strided_slice %100 {offsets = [0, 19], sizes = [8, 288], strides = [1, 1]} : vector<8x326xf32> to vector<8x288xf32>
    %c32_88 = arith.constant 32 : index
    %c0_89 = arith.constant 0 : index
    %110 = vector.load %arg10[%c32_88, %c0_89] : memref<72x288xf32, #tpu.memory_space<vmem>>, vector<8x288xf32>
    tpu.vector_store %arg10[%c32_88, %c0_89], %109 {strides = array<i32>} : memref<72x288xf32, #tpu.memory_space<vmem>>, vector<8x288xf32>,
    %111 = vector.extract_strided_slice %100 {offsets = [0, 20], sizes = [8, 288], strides = [1, 1]} : vector<8x326xf32> to vector<8x288xf32>
    %c40_90 = arith.constant 40 : index
    %c0_91 = arith.constant 0 : index
    %112 = vector.load %arg10[%c40_90, %c0_91] : memref<72x288xf32, #tpu.memory_space<vmem>>, vector<8x288xf32>
    tpu.vector_store %arg10[%c40_90, %c0_91], %111 {strides = array<i32>} : memref<72x288xf32, #tpu.memory_space<vmem>>, vector<8x288xf32>,
    %113 = vector.extract_strided_slice %100 {offsets = [0, 36], sizes = [8, 288], strides = [1, 1]} : vector<8x326xf32> to vector<8x288xf32>
    %c48_92 = arith.constant 48 : index
    %c0_93 = arith.constant 0 : index
    %114 = vector.load %arg10[%c48_92, %c0_93] : memref<72x288xf32, #tpu.memory_space<vmem>>, vector<8x288xf32>
    tpu.vector_store %arg10[%c48_92, %c0_93], %113 {strides = array<i32>} : memref<72x288xf32, #tpu.memory_space<vmem>>, vector<8x288xf32>,
    %115 = vector.extract_strided_slice %100 {offsets = [0, 37], sizes = [8, 288], strides = [1, 1]} : vector<8x326xf32> to vector<8x288xf32>
    %c56_94 = arith.constant 56 : index
    %c0_95 = arith.constant 0 : index
    %116 = vector.load %arg10[%c56_94, %c0_95] : memref<72x288xf32, #tpu.memory_space<vmem>>, vector<8x288xf32>
    tpu.vector_store %arg10[%c56_94, %c0_95], %115 {strides = array<i32>} : memref<72x288xf32, #tpu.memory_space<vmem>>, vector<8x288xf32>,
    %117 = vector.extract_strided_slice %100 {offsets = [0, 38], sizes = [8, 288], strides = [1, 1]} : vector<8x326xf32> to vector<8x288xf32>
    %c64_96 = arith.constant 64 : index
    %c0_97 = arith.constant 0 : index
    %118 = vector.load %arg10[%c64_96, %c0_97] : memref<72x288xf32, #tpu.memory_space<vmem>>, vector<8x288xf32>
    tpu.vector_store %arg10[%c64_96, %c0_97], %117 {strides = array<i32>} : memref<72x288xf32, #tpu.memory_space<vmem>>, vector<8x288xf32>,
    %c0_98 = arith.constant 0 : index
    %c0_99 = arith.constant 0 : index
    %119 = vector.load %arg10[%c0_98, %c0_99] : memref<72x288xf32, #tpu.memory_space<vmem>>, vector<72x288xf32>
    %120 = arith.truncf %119 : vector<72x288xf32> to vector<72x288xbf16>
    %c0_100 = arith.constant 0 : index
    %c0_101 = arith.constant 0 : index
    %121 = vector.load %arg4[%c0_100, %c0_101] : memref<8x72xbf16, #tpu.memory_space<vmem>>, vector<8x72xbf16>
    %cst_102 = arith.constant dense<0.000000e+00> : vector<8x288xf32>
    %122 = tpu.matmul %121, %120, %cst_102 {dimension_numbers = #tpu.dot_dimension_numbers<[1], [0], [0], [1], [0, 0, 1, 1], [], []>} : vector<8x72xbf16>, vector<72x288xbf16>, vector<8x288xf32> -> vector<8x288xf32>
    %c0_103 = arith.constant 0 : index
    %c0_104 = arith.constant 0 : index
    %123 = vector.load %arg5[%c0_103, %c0_104] : memref<8x1xf32, #tpu.memory_space<vmem>>, vector<8x1xf32>
    %124 = vector.broadcast %123 : vector<8x1xf32> to vector<8x288xf32>
    %125 = arith.addf %122, %124 : vector<8x288xf32>
    %cst_105 = arith.constant 0.000000e+00 : f32
    %126 = vector.broadcast %cst_105 : f32 to vector<8x288xf32>
    %127 = arith.maximumf %125, %126 : vector<8x288xf32>
    %128 = vector.extract_strided_slice %127 {offsets = [0, 0], sizes = [8, 16], strides = [1, 1]} : vector<8x288xf32> to vector<8x16xf32>
    %c0_106 = arith.constant 0 : index
    %c0_107 = arith.constant 0 : index
    %c0_108 = arith.constant 0 : index
    %129 = vector.load %arg6[%c0_106, %c0_107, %c0_108] : memref<1x8x256xf32, #tpu.memory_space<vmem>>, vector<1x8x16xf32>
    %130 = vector.shape_cast %129 : vector<1x8x16xf32> to vector<8x16xf32>
    %131 = vector.shape_cast %128 : vector<8x16xf32> to vector<1x8x16xf32>
    tpu.vector_store %arg6[%c0_106, %c0_107, %c0_108], %131 {strides = array<i32>} : memref<1x8x256xf32, #tpu.memory_space<vmem>>, vector<1x8x16xf32>,
    %132 = vector.extract_strided_slice %127 {offsets = [0, 18], sizes = [8, 16], strides = [1, 1]} : vector<8x288xf32> to vector<8x16xf32>
    %c0_109 = arith.constant 0 : index
    %c0_110 = arith.constant 0 : index
    %c16_111 = arith.constant 16 : index
    %133 = vector.load %arg6[%c0_109, %c0_110, %c16_111] : memref<1x8x256xf32, #tpu.memory_space<vmem>>, vector<1x8x16xf32>
    %134 = vector.shape_cast %133 : vector<1x8x16xf32> to vector<8x16xf32>
    %135 = vector.shape_cast %132 : vector<8x16xf32> to vector<1x8x16xf32>
    tpu.vector_store %arg6[%c0_109, %c0_110, %c16_111], %135 {strides = array<i32>} : memref<1x8x256xf32, #tpu.memory_space<vmem>>, vector<1x8x16xf32>,
    %136 = vector.extract_strided_slice %127 {offsets = [0, 36], sizes = [8, 16], strides = [1, 1]} : vector<8x288xf32> to vector<8x16xf32>
    %c0_112 = arith.constant 0 : index
    %c0_113 = arith.constant 0 : index
    %c32_114 = arith.constant 32 : index
    %137 = vector.load %arg6[%c0_112, %c0_113, %c32_114] : memref<1x8x256xf32, #tpu.memory_space<vmem>>, vector<1x8x16xf32>
    %138 = vector.shape_cast %137 : vector<1x8x16xf32> to vector<8x16xf32>
    %139 = vector.shape_cast %136 : vector<8x16xf32> to vector<1x8x16xf32>
    tpu.vector_store %arg6[%c0_112, %c0_113, %c32_114], %139 {strides = array<i32>} : memref<1x8x256xf32, #tpu.memory_space<vmem>>, vector<1x8x16xf32>,
    %140 = vector.extract_strided_slice %127 {offsets = [0, 54], sizes = [8, 16], strides = [1, 1]} : vector<8x288xf32> to vector<8x16xf32>
    %c0_115 = arith.constant 0 : index
    %c0_116 = arith.constant 0 : index
    %c48_117 = arith.constant 48 : index
    %141 = vector.load %arg6[%c0_115, %c0_116, %c48_117] : memref<1x8x256xf32, #tpu.memory_space<vmem>>, vector<1x8x16xf32>
    %142 = vector.shape_cast %141 : vector<1x8x16xf32> to vector<8x16xf32>
    %143 = vector.shape_cast %140 : vector<8x16xf32> to vector<1x8x16xf32>
    tpu.vector_store %arg6[%c0_115, %c0_116, %c48_117], %143 {strides = array<i32>} : memref<1x8x256xf32, #tpu.memory_space<vmem>>, vector<1x8x16xf32>,
    %144 = vector.extract_strided_slice %127 {offsets = [0, 72], sizes = [8, 16], strides = [1, 1]} : vector<8x288xf32> to vector<8x16xf32>
    %c0_118 = arith.constant 0 : index
    %c0_119 = arith.constant 0 : index
    %c64_120 = arith.constant 64 : index
    %145 = vector.load %arg6[%c0_118, %c0_119, %c64_120] : memref<1x8x256xf32, #tpu.memory_space<vmem>>, vector<1x8x16xf32>
    %146 = vector.shape_cast %145 : vector<1x8x16xf32> to vector<8x16xf32>
    %147 = vector.shape_cast %144 : vector<8x16xf32> to vector<1x8x16xf32>
    tpu.vector_store %arg6[%c0_118, %c0_119, %c64_120], %147 {strides = array<i32>} : memref<1x8x256xf32, #tpu.memory_space<vmem>>, vector<1x8x16xf32>,
    %148 = vector.extract_strided_slice %127 {offsets = [0, 90], sizes = [8, 16], strides = [1, 1]} : vector<8x288xf32> to vector<8x16xf32>
    %c0_121 = arith.constant 0 : index
    %c0_122 = arith.constant 0 : index
    %c80 = arith.constant 80 : index
    %149 = vector.load %arg6[%c0_121, %c0_122, %c80] : memref<1x8x256xf32, #tpu.memory_space<vmem>>, vector<1x8x16xf32>
    %150 = vector.shape_cast %149 : vector<1x8x16xf32> to vector<8x16xf32>
    %151 = vector.shape_cast %148 : vector<8x16xf32> to vector<1x8x16xf32>
    tpu.vector_store %arg6[%c0_121, %c0_122, %c80], %151 {strides = array<i32>} : memref<1x8x256xf32, #tpu.memory_space<vmem>>, vector<1x8x16xf32>,
    %152 = vector.extract_strided_slice %127 {offsets = [0, 108], sizes = [8, 16], strides = [1, 1]} : vector<8x288xf32> to vector<8x16xf32>
    %c0_123 = arith.constant 0 : index
    %c0_124 = arith.constant 0 : index
    %c96 = arith.constant 96 : index
    %153 = vector.load %arg6[%c0_123, %c0_124, %c96] : memref<1x8x256xf32, #tpu.memory_space<vmem>>, vector<1x8x16xf32>
    %154 = vector.shape_cast %153 : vector<1x8x16xf32> to vector<8x16xf32>
    %155 = vector.shape_cast %152 : vector<8x16xf32> to vector<1x8x16xf32>
    tpu.vector_store %arg6[%c0_123, %c0_124, %c96], %155 {strides = array<i32>} : memref<1x8x256xf32, #tpu.memory_space<vmem>>, vector<1x8x16xf32>,
    %156 = vector.extract_strided_slice %127 {offsets = [0, 126], sizes = [8, 16], strides = [1, 1]} : vector<8x288xf32> to vector<8x16xf32>
    %c0_125 = arith.constant 0 : index
    %c0_126 = arith.constant 0 : index
    %c112 = arith.constant 112 : index
    %157 = vector.load %arg6[%c0_125, %c0_126, %c112] : memref<1x8x256xf32, #tpu.memory_space<vmem>>, vector<1x8x16xf32>
    %158 = vector.shape_cast %157 : vector<1x8x16xf32> to vector<8x16xf32>
    %159 = vector.shape_cast %156 : vector<8x16xf32> to vector<1x8x16xf32>
    tpu.vector_store %arg6[%c0_125, %c0_126, %c112], %159 {strides = array<i32>} : memref<1x8x256xf32, #tpu.memory_space<vmem>>, vector<1x8x16xf32>,
    %160 = vector.extract_strided_slice %127 {offsets = [0, 144], sizes = [8, 16], strides = [1, 1]} : vector<8x288xf32> to vector<8x16xf32>
    %c0_127 = arith.constant 0 : index
    %c0_128 = arith.constant 0 : index
    %c128 = arith.constant 128 : index
    %161 = vector.load %arg6[%c0_127, %c0_128, %c128] : memref<1x8x256xf32, #tpu.memory_space<vmem>>, vector<1x8x16xf32>
    %162 = vector.shape_cast %161 : vector<1x8x16xf32> to vector<8x16xf32>
    %163 = vector.shape_cast %160 : vector<8x16xf32> to vector<1x8x16xf32>
    tpu.vector_store %arg6[%c0_127, %c0_128, %c128], %163 {strides = array<i32>} : memref<1x8x256xf32, #tpu.memory_space<vmem>>, vector<1x8x16xf32>,
    %164 = vector.extract_strided_slice %127 {offsets = [0, 162], sizes = [8, 16], strides = [1, 1]} : vector<8x288xf32> to vector<8x16xf32>
    %c0_129 = arith.constant 0 : index
    %c0_130 = arith.constant 0 : index
    %c144 = arith.constant 144 : index
    %165 = vector.load %arg6[%c0_129, %c0_130, %c144] : memref<1x8x256xf32, #tpu.memory_space<vmem>>, vector<1x8x16xf32>
    %166 = vector.shape_cast %165 : vector<1x8x16xf32> to vector<8x16xf32>
    %167 = vector.shape_cast %164 : vector<8x16xf32> to vector<1x8x16xf32>
    tpu.vector_store %arg6[%c0_129, %c0_130, %c144], %167 {strides = array<i32>} : memref<1x8x256xf32, #tpu.memory_space<vmem>>, vector<1x8x16xf32>,
    %168 = vector.extract_strided_slice %127 {offsets = [0, 180], sizes = [8, 16], strides = [1, 1]} : vector<8x288xf32> to vector<8x16xf32>
    %c0_131 = arith.constant 0 : index
    %c0_132 = arith.constant 0 : index
    %c160 = arith.constant 160 : index
    %169 = vector.load %arg6[%c0_131, %c0_132, %c160] : memref<1x8x256xf32, #tpu.memory_space<vmem>>, vector<1x8x16xf32>
    %170 = vector.shape_cast %169 : vector<1x8x16xf32> to vector<8x16xf32>
    %171 = vector.shape_cast %168 : vector<8x16xf32> to vector<1x8x16xf32>
    tpu.vector_store %arg6[%c0_131, %c0_132, %c160], %171 {strides = array<i32>} : memref<1x8x256xf32, #tpu.memory_space<vmem>>, vector<1x8x16xf32>,
    %172 = vector.extract_strided_slice %127 {offsets = [0, 198], sizes = [8, 16], strides = [1, 1]} : vector<8x288xf32> to vector<8x16xf32>
    %c0_133 = arith.constant 0 : index
    %c0_134 = arith.constant 0 : index
    %c176 = arith.constant 176 : index
    %173 = vector.load %arg6[%c0_133, %c0_134, %c176] : memref<1x8x256xf32, #tpu.memory_space<vmem>>, vector<1x8x16xf32>
    %174 = vector.shape_cast %173 : vector<1x8x16xf32> to vector<8x16xf32>
    %175 = vector.shape_cast %172 : vector<8x16xf32> to vector<1x8x16xf32>
    tpu.vector_store %arg6[%c0_133, %c0_134, %c176], %175 {strides = array<i32>} : memref<1x8x256xf32, #tpu.memory_space<vmem>>, vector<1x8x16xf32>,
    %176 = vector.extract_strided_slice %127 {offsets = [0, 216], sizes = [8, 16], strides = [1, 1]} : vector<8x288xf32> to vector<8x16xf32>
    %c0_135 = arith.constant 0 : index
    %c0_136 = arith.constant 0 : index
    %c192 = arith.constant 192 : index
    %177 = vector.load %arg6[%c0_135, %c0_136, %c192] : memref<1x8x256xf32, #tpu.memory_space<vmem>>, vector<1x8x16xf32>
    %178 = vector.shape_cast %177 : vector<1x8x16xf32> to vector<8x16xf32>
    %179 = vector.shape_cast %176 : vector<8x16xf32> to vector<1x8x16xf32>
    tpu.vector_store %arg6[%c0_135, %c0_136, %c192], %179 {strides = array<i32>} : memref<1x8x256xf32, #tpu.memory_space<vmem>>, vector<1x8x16xf32>,
    %180 = vector.extract_strided_slice %127 {offsets = [0, 234], sizes = [8, 16], strides = [1, 1]} : vector<8x288xf32> to vector<8x16xf32>
    %c0_137 = arith.constant 0 : index
    %c0_138 = arith.constant 0 : index
    %c208 = arith.constant 208 : index
    %181 = vector.load %arg6[%c0_137, %c0_138, %c208] : memref<1x8x256xf32, #tpu.memory_space<vmem>>, vector<1x8x16xf32>
    %182 = vector.shape_cast %181 : vector<1x8x16xf32> to vector<8x16xf32>
    %183 = vector.shape_cast %180 : vector<8x16xf32> to vector<1x8x16xf32>
    tpu.vector_store %arg6[%c0_137, %c0_138, %c208], %183 {strides = array<i32>} : memref<1x8x256xf32, #tpu.memory_space<vmem>>, vector<1x8x16xf32>,
    %184 = vector.extract_strided_slice %127 {offsets = [0, 252], sizes = [8, 16], strides = [1, 1]} : vector<8x288xf32> to vector<8x16xf32>
    %c0_139 = arith.constant 0 : index
    %c0_140 = arith.constant 0 : index
    %c224 = arith.constant 224 : index
    %185 = vector.load %arg6[%c0_139, %c0_140, %c224] : memref<1x8x256xf32, #tpu.memory_space<vmem>>, vector<1x8x16xf32>
    %186 = vector.shape_cast %185 : vector<1x8x16xf32> to vector<8x16xf32>
    %187 = vector.shape_cast %184 : vector<8x16xf32> to vector<1x8x16xf32>
    tpu.vector_store %arg6[%c0_139, %c0_140, %c224], %187 {strides = array<i32>} : memref<1x8x256xf32, #tpu.memory_space<vmem>>, vector<1x8x16xf32>,
    %188 = vector.extract_strided_slice %127 {offsets = [0, 270], sizes = [8, 16], strides = [1, 1]} : vector<8x288xf32> to vector<8x16xf32>
    %c0_141 = arith.constant 0 : index
    %c0_142 = arith.constant 0 : index
    %c240 = arith.constant 240 : index
    %189 = vector.load %arg6[%c0_141, %c0_142, %c240] : memref<1x8x256xf32, #tpu.memory_space<vmem>>, vector<1x8x16xf32>
    %190 = vector.shape_cast %189 : vector<1x8x16xf32> to vector<8x16xf32>
    %191 = vector.shape_cast %188 : vector<8x16xf32> to vector<1x8x16xf32>
    tpu.vector_store %arg6[%c0_141, %c0_142, %c240], %191 {strides = array<i32>} : memref<1x8x256xf32, #tpu.memory_space<vmem>>, vector<1x8x16xf32>,
    return
  }
  func.func @transform_0(%arg0: i32) -> (i32, i32, i32) {
    %c0_i32 = arith.constant 0 : i32
    %c0_i32_0 = arith.constant 0 : i32
    %c0_i32_1 = arith.constant 0 : i32
    return %arg0, %c0_i32, %c0_i32_0 : i32, i32, i32
  }
  func.func @transform_1(%arg0: i32) -> (i32, i32) {
    %c0_i32 = arith.constant 0 : i32
    %c0_i32_0 = arith.constant 0 : i32
    %c0_i32_1 = arith.constant 0 : i32
    return %c0_i32, %c0_i32_0 : i32, i32
  }
  func.func @transform_2(%arg0: i32) -> (i32, i32) {
    %c0_i32 = arith.constant 0 : i32
    %c0_i32_0 = arith.constant 0 : i32
    %c0_i32_1 = arith.constant 0 : i32
    return %c0_i32, %c0_i32_0 : i32, i32
  }
  func.func @transform_3(%arg0: i32) -> (i32, i32) {
    %c0_i32 = arith.constant 0 : i32
    %c0_i32_0 = arith.constant 0 : i32
    %c0_i32_1 = arith.constant 0 : i32
    return %c0_i32, %c0_i32_0 : i32, i32
  }
  func.func @transform_4(%arg0: i32) -> (i32, i32) {
    %c0_i32 = arith.constant 0 : i32
    %c0_i32_0 = arith.constant 0 : i32
    %c0_i32_1 = arith.constant 0 : i32
    return %c0_i32, %c0_i32_0 : i32, i32
  }
  func.func @transform_5(%arg0: i32) -> (i32, i32, i32) {
    %c0_i32 = arith.constant 0 : i32
    %c0_i32_0 = arith.constant 0 : i32
    %c0_i32_1 = arith.constant 0 : i32
    return %arg0, %c0_i32, %c0_i32_0 : i32, i32, i32
  }
}

</mosaic_0001>

<bundles_post_ra>
// kernel: tpu_custom_call.1
= control target key start
LH: loop header
LB: loop body
LE: loop exit
PB: predicated region body
PF: predicated region fallthrough
CT: control target
= control target key end

     0   :  { %10 = vsyncpa [#allocation7], 0  ;;  %s1752_s0 = inlined_call_operand.vmem [shape: f32[2,4,256], index: 0, kind: input, shape index: {}]   ;;  %s1753_s1 = inlined_call_operand.vmem [shape: bf16[8,72], index: 1, kind: input, shape index: {}]   ;;  %s1754_s2 = inlined_call_operand.vmem [shape: f32[8,1], index: 2, kind: input, shape index: {}]   ;;  %s1755_s3 = inlined_call_operand.vmem [shape: bf16[8,72], index: 3, kind: input, shape index: {}]   ;;  %s1756_s4 = inlined_call_operand.vmem [shape: f32[8,1], index: 4, kind: input, shape index: {}]   ;;  %s1757_s5 = inlined_call_operand.hbm [shape: f32[2,8,256], index: 5, kind: output, shape index: {}]  }
   0x1   :  { %12 = vsyncpa [#allocation7 + $0x1], 0  ;;  %s1392_s18 = smov 0   ;;  %s1394_s19 = smov 0  }
   0x2   :  { %s1396_s20 = smov 0   ;;  %s1398_s21 = smov 0  }
   0x3 LB: > { %s1413_s22 = sadd.s32 4294967295, %s1320_s21   ;;  %s1118_s23 = sadd.s32 4294967294, %s1320_s21   ;;  %s1320_s21 = sphi %s1398_s21, %s1794_s21   ;;  %s1316_s20 = sphi %s1396_s20, %s1793_s20   ;;  %s1312_s19 = sphi %s1394_s19, %s1792_s19   ;;  %s1308_s18 = sphi %s1392_s18, %s1791_s18  }
   0x4   : > { %s1417_s24 = sadd.s32 1, %s1320_s21   ;;  %s135_s25 = sadd.s32 1, %s1316_s20 }
   0x5   : > { %s132_s26 = ssub.s32 %s1320_s21, %s1417_s24  ;;  %p145_p0 = scmp.ne.s32.totalorder %s1316_s20, %s1312_s19 }
   0x6   : > { %p133_p1 = scmp.eq.s32.totalorder %s132_s26, 0  ;;  %p146_p2 = scmp.eq.s32.totalorder %s1413_s22, 1 }
   0x7   : > { %p151_p3 = scmp.ne.s32.totalorder %s1312_s19, %s1308_s18  ;;  %p152_p4 = scmp.eq.s32.totalorder %s1118_s23, 1 }
   0x8   : > { %s1428_s27 = scalar_select %p133_p1, %s1316_s20, %s135_s25  }
   0x9   : > { %p1430_p5 = por %p146_p2, %p145_p0  ;;  %p1434_p6 = por %p152_p4, %p151_p3 }
   0xa   : > { %p1121_p7 = scmp.ge.s32.totalorder %s1320_s21, 1  ;;  %p190_p8 = scmp.lt.s32.totalorder %s1320_s21, 3 }
   0xc   : > { %p191_p9 = pnand %p1121_p7, %p190_p8 }
   0xd   : > { %p218_p10 = scmp.lt.s32.totalorder (!%p191_p9), %s1413_s22, 1  ;;  %v1322_v0 = vmov (!%p191_p9), 0.0   ;;  %s1323_s10 = smov (!%p191_p9), 23   ;;  %vm225_vm0 = vcmask (!%p191_p9), 568320   ;;  %vm229_vm1 = vcmask (!%p191_p9), 261120   ;;  %vm260_vm2 = vcmask (!%p191_p9), 281752  }
   0xe   : > { %194 = sbr.rel (%p191_p9) target bundleno = 1252 (0x4e4), region = 40  ;;  %224 = vst [vmem:[#allocation2] sm:$0xff] (!%p191_p9), %v1322_v0  ;;  %227 = vst [vmem:[#allocation3] sm:$0xff] (!%p191_p9), %v1322_v0  ;;  %1150 = vmatprep.subr.bf16.mxu1 (!%p191_p9), %v1322_v0  ;;  %s1324_s11 = smov (!%p191_p9), 19   ;;  %vm265_vm3 = vcmask (!%p191_p9), 429352   ;;  %vm270_vm4 = vcmask (!%p191_p9), 576952  }
   0xf   : > { %228 = vst [vmem:[#allocation3 + $0x8] sm:$0xff] (!%p191_p9), %v1322_v0  ;;  %231 = vst [vmem:[#allocation3 + $0x18] sm:$0xff] (!%p191_p9), %v1322_v0  ;;  %s1325_s12 = smov (!%p191_p9), 25   ;;  %s1326_s13 = smov (!%p191_p9), 21   ;;  %vm275_vm5 = vcmask (!%p191_p9), 724552   ;;  %vm280_vm6 = vcmask (!%p191_p9), 872152  }
  0x10   : > { %232 = vst [vmem:[#allocation3 + $0x20] sm:$0xff] (!%p191_p9), %v1322_v0  ;;  %234 = vst [vmem:[#allocation3 + $0x30] sm:$0xff] (!%p191_p9), %v1322_v0  ;;  %s1327_s14 = smov (!%p191_p9), 27   ;;  %s1328_s15 = smov (!%p191_p9), 31   ;;  %vm293_vm7 = vcmask (!%p191_p9), 1044472   ;;  %vm294_vm8 = vcmask (!%p191_p9), 121860  }
  0x11   : > { %235 = vst [vmem:[#allocation3 + $0x38] sm:$0xff] (!%p191_p9), %v1322_v0  ;;  %237 = vst [vmem:[#allocation3 + $0x48] sm:$0xff] (!%p191_p9), %v1322_v0  ;;  %s1329_s16 = smov (!%p191_p9), 35   ;;  %s1330_s17 = smov (!%p191_p9), 29   ;;  %vm290_vm9 = vcmask (!%p191_p9), 252928   ;;  %vm285_vm10 = vcmask (!%p191_p9), 1019752  }
  0x12   : > { %238 = vst [vmem:[#allocation3 + $0x50] sm:$0xff] (!%p191_p9), %v1322_v0  ;;  %240 = vst [vmem:[#allocation3 + $0x60] sm:$0xff] (!%p191_p9), %v1322_v0  ;;  %s1331_s23 = smov (!%p191_p9), 33   ;;  %s1332_s25 = smov (!%p191_p9), 37   ;;  %vm305_vm12 = vcmask (!%p191_p9), 285696   ;;  %vm300_vm13 = vcmask (!%p191_p9), 265352  }
  0x13   : > { %241 = vst [vmem:[#allocation3 + $0x68] sm:$0xff] (!%p191_p9), %v1322_v0  ;;  %243 = vst [vmem:[#allocation3 + $0x78] sm:$0xff] (!%p191_p9), %v1322_v0  ;;  %s1333_s26 = smov (!%p191_p9), 41   ;;  %s1336_s7 = smov (!%p191_p9), 43   ;;  %vm308_vm14 = vcmask (!%p191_p9), 412952   ;;  %vm313_vm15 = vcmask (!%p191_p9), 302080  }
  0x14   : > { %244 = vst [vmem:[#allocation3 + $0x80] sm:$0xff] (!%p191_p9), %v1322_v0  ;;  %246 = vst [vmem:[#allocation3 + $0x90] sm:$0xff] (!%p191_p9), %v1322_v0  ;;  %s1337_s8 = smov (!%p191_p9), 47   ;;  %v1347_v37 = vmov (!%p191_p9), 0   ;;  %v537_v38 = vld [vmem:[%s1754_s2] sm:$0xff] (!%p191_p9) }
  0x15   : > { %247 = vst [vmem:[#allocation3 + $0x98] sm:$0xff] %v1322_v0  ;;  %249 = vst [vmem:[#allocation3 + $0xa8] sm:$0xff] %v1322_v0  ;;  %s219_s30 = scalar_select %p218_p10, %s1413_s22, 1  ;;  %589 = vmatprep.mubr.bf16.mxu0 %v1347_v37  ;;  %1256 = vset.pattern.permute.xlu0 %v1347_v37 }
  0x16   : > { %250 = vst [vmem:[#allocation3 + $0xb0] sm:$0xff] %v1322_v0  ;;  %252 = vst [vmem:[#allocation3 + $0xc0] sm:$0xff] %v1322_v0  ;;  %1257 = vset.pattern.permute.xlu1 %v1347_v37 }
  0x17   : > { %253 = vst [vmem:[#allocation3 + $0xc8] sm:$0xff] %v1322_v0  ;;  %641 = vst [vmem:[#allocation4] sm:$0xff] %v1322_v0  ;;  %s1136_s6 = sshll.u32 %s219_s30, 3  ;;  %s1334_s30 = smov 39  }
  0x18   : > { %642 = vst [vmem:[#allocation4 + $0x8] sm:$0xff] %v1322_v0  ;;  %s222_s9 = scalar_lea.vmem %s1752_s0, %s1136_s6  ;;  %226 = vst.msk [vmem:[#allocation2 + $0x8] sm:$0xf] %vm225_vm0, %v1322_v0  ;;  %s1335_s6 = smov 45   ;;  %vm316_vm0 = vcmask 560552  }
  0x19   : > { %v255_v1 = vld [vmem:[%s222_s9] sm:$0xff]  ;;  %s1338_s9 = smov 49   ;;  %233 = vst.msk [vmem:[#allocation3 + $0x28] sm:$0xff] %vm229_vm1, %v1322_v0  ;;  %230 = vst.msk [vmem:[#allocation3 + $0x10] sm:$0xff] %vm229_vm1, %v1322_v0 }
  0x1a   : > { %267 = vrot.lane.b32.xlu1 %v255_v1, %s1323_s10  ;;  %257 = vrot.lane.b32.xlu0 %v255_v1, %s1324_s11  ;;  %236 = vst.msk [vmem:[#allocation3 + $0x40] sm:$0xff] %vm229_vm1, %v1322_v0  ;;  %239 = vst.msk [vmem:[#allocation3 + $0x58] sm:$0xff] %vm229_vm1, %v1322_v0  ;;  %s1339_s10 = smov 126  }
  0x1b   : > { %242 = vst.msk [vmem:[#allocation3 + $0x70] sm:$0xff] %vm229_vm1, %v1322_v0  ;;  %245 = vst.msk [vmem:[#allocation3 + $0x88] sm:$0xff] %vm229_vm1, %v1322_v0 }
  0x1c   : > { %248 = vst.msk [vmem:[#allocation3 + $0xa0] sm:$0xff] %vm229_vm1, %v1322_v0  ;;  %251 = vst.msk [vmem:[#allocation3 + $0xb8] sm:$0xff] %vm229_vm1, %v1322_v0 }
  0x1d   : > { %254 = vst.msk [vmem:[#allocation3 + $0xd0] sm:$0xff] %vm229_vm1, %v1322_v0  ;;  %vm295_vm11 = vmor %vm294_vm8, %vm293_vm7  ;;  %vm349_vm7 = vcmask 105476   ;;  %vm345_vm8 = vcmask 367616  }
  0x1e   : > { %272 = vrot.lane.b32.xlu1 %v255_v1, %s1325_s12  ;;  %262 = vrot.lane.b32.xlu0 %v255_v1, %s1326_s13  ;;  %s1340_s12 = smov 127   ;;  %s1341_s13 = smov 109  }
  0x22   : > { %277 = vrot.lane.b32.xlu1 %v255_v1, %s1327_s14  ;;  %287 = vrot.lane.b32.xlu0 %v255_v1, %s1328_s15  ;;  %s1342_s14 = smov 110   ;;  %s1343_s15 = smov 92  }
  0x26   : > { %302 = vrot.lane.b32.xlu1 %v255_v1, %s1329_s16  ;;  %282 = vrot.lane.b32.xlu0 %v255_v1, %s1330_s17  ;;  %s1344_s16 = smov 108   ;;  %s1345_s17 = smov 90  }
  0x2a   : > { %297 = vrot.lane.b32.xlu1 %v255_v1, %s1331_s23  ;;  %310 = vrot.lane.b32.xlu0 %v255_v1, %s1332_s25  ;;  %s1346_s23 = smov 91   ;;  %s1351_s25 = smov 122  }
  0x2e   : > { %326 = vrot.lane.b32.xlu1 %v255_v1, %s1333_s26  ;;  %318 = vrot.lane.b32.xlu0 %v255_v1, %s1334_s30  ;;  %s1352_s26 = smov 114   ;;  %s1354_s30 = smov 112  }
  0x32   : > { %342 = vrot.lane.b32.xlu1 %v255_v1, %s1335_s6  ;;  %334 = vrot.lane.b32.xlu0 %v255_v1, %s1336_s7  ;;  %s1355_s6 = smov 118   ;;  %s1357_s7 = smov 106  }
  0x36   : > { %352 = vrot.lane.b32.xlu0 %v255_v1, %s1337_s8  ;;  %358 = vrot.lane.b32.xlu1 %v255_v1, %s1338_s9  ;;  %s1358_s8 = smov 104   ;;  %s1359_s9 = smov 102  }
  0x8c   : > { %v268_v2 = vpop.permute.xlu1 %267  ;;  %v258_v3 = vpop.permute.xlu0 %257 }
  0x8d   : > { %261 = vst.msk [vmem:[#allocation2] sm:$0xf] %vm260_vm2, %v258_v3  ;;  %vm329_vm2 = vcmask 334848  }
  0x90   : > { %v273_v4 = vpop.permute.xlu1 %272  ;;  %v263_v5 = vpop.permute.xlu0 %262 }
  0x91   : > { %266 = vst.msk [vmem:[#allocation2] sm:$0xf] %vm265_vm3, %v263_v5  ;;  %vm321_vm3 = vcmask 318464  }
  0x92   : > { %271 = vst.msk [vmem:[#allocation2] sm:$0xf] %vm270_vm4, %v268_v2  ;;  %vm324_vm4 = vcmask 708152  }
  0x93   : > { %276 = vst.msk [vmem:[#allocation2] sm:$0xf] %vm275_vm5, %v273_v4  ;;  %vm332_vm5 = vcmask 855752  }
  0x94   : > { %v278_v6 = vpop.permute.xlu1 %277  ;;  %v288_v7 = vpop.permute.xlu0 %287 }
  0x95   : > { %281 = vst.msk [vmem:[#allocation2] sm:$0xf] %vm280_vm6, %v278_v6  ;;  %v289_v8 = vrot.slane %v288_v7, 4  ;;  %vm348_vm6 = vcmask 1044456  }
  0x97   : > { %v291_v11 = vsel %vm290_vm9, %v289_v8, %v288_v7  ;;  %vm337_vm9 = vcmask 351232  }
  0x98   : > { %v303_v9 = vpop.permute.xlu1 %302  ;;  %v283_v10 = vpop.permute.xlu0 %282 }
  0x99   : > { %v304_v12 = vrot.slane %v303_v9, 4  ;;  %286 = vst.msk [vmem:[#allocation2] sm:$0xf] %vm285_vm10, %v283_v10  ;;  %vm340_vm10 = vcmask 1003352  }
  0x9a   : > { %296 = vst.msk [vmem:[#allocation2] sm:$0xff] %vm295_vm11, %v291_v11  ;;  %vm350_vm11 = vmor %vm349_vm7, %vm348_vm6  ;;  %vm1762_vm6 = vcmask 752640   ;;  %vm1761_vm7 = vcmask 744448  }
  0x9b   : > { %v306_v15 = vsel %vm305_vm12, %v303_v9, %v304_v12  ;;  %vm356_vm12 = vcmask 248952  }
  0x9c   : > { %v298_v13 = vpop.permute.xlu1 %297  ;;  %v311_v14 = vpop.permute.xlu0 %310 }
  0x9d   : > { %301 = vst.msk [vmem:[#allocation2 + $0x4] sm:$0xf] %vm300_vm13, %v298_v13  ;;  %v312_v16 = vrot.slane %v311_v14, 4  ;;  %vm362_vm13 = vcmask 396552  }
  0x9e   : > { %309 = vst.msk [vmem:[#allocation2 + $0x4] sm:$0xf] %vm308_vm14, %v306_v15  ;;  %vm372_vm14 = vcmask 257024  }
  0x9f   : > { %v314_v17 = vsel %vm313_vm15, %v311_v14, %v312_v16  ;;  %vm1348_vm15 = vmmov 0  }
  0xa0   : > { %317 = vst.msk [vmem:[#allocation2 + $0x4] sm:$0xf] %vm316_vm0, %v314_v17  ;;  %v327_v18 = vpop.permute.xlu1 %326  ;;  %v319_v19 = vpop.permute.xlu0 %318  ;;  %1160 = vmatprep.mubr.msk.bf16.mxu1 %vm1348_vm15, %v1322_v0  ;;  %vm1764_vm0 = vcmask 1039360  }
  0xa1   : > { %v328_v20 = vrot.slane %v327_v18, 4  ;;  %v320_v21 = vrot.slane %v319_v19, 4 }
  0xa3   : > { %v330_v22 = vsel %vm329_vm2, %v327_v18, %v328_v20  ;;  %v322_v23 = vsel %vm321_vm3, %v319_v19, %v320_v21  ;;  %vm1767_vm2 = vcmask 1031168   ;;  %vm1766_vm3 = vcmask 900096  }
  0xa4   : > { %325 = vst.msk [vmem:[#allocation2 + $0x4] sm:$0xf] %vm324_vm4, %v322_v23  ;;  %v343_v24 = vpop.permute.xlu1 %342  ;;  %v335_v25 = vpop.permute.xlu0 %334  ;;  %vm1765_vm4 = vcmask 891904  }
  0xa5   : > { %v344_v26 = vrot.slane %v343_v24, 4  ;;  %333 = vst.msk [vmem:[#allocation2 + $0x4] sm:$0xf] %vm332_vm5, %v330_v22  ;;  %v336_v27 = vrot.slane %v335_v25, 4  ;;  %vm1763_vm5 = vcmask 883712  }
  0xa7   : > { %v346_v28 = vsel %vm345_vm8, %v343_v24, %v344_v26  ;;  %v338_v29 = vsel %vm337_vm9, %v335_v25, %v336_v27  ;;  %vm1760_vm8 = vcmask 736256   ;;  %vm1759_vm9 = vcmask 1043456  }
  0xa8   : > { %341 = vst.msk [vmem:[#allocation2 + $0x4] sm:$0xf] %vm340_vm10, %v338_v29  ;;  %v353_v30 = vpop.permute.xlu0 %352  ;;  %v359_v31 = vpop.permute.xlu1 %358  ;;  %vm1758_vm10 = vcmask 588800  }
  0xa9   : > { %351 = vst.msk [vmem:[#allocation2 + $0x4] sm:$0xff] %vm350_vm11, %v346_v28  ;;  %v354_v32 = vrot.slane %v353_v30, 4  ;;  %v360_v33 = vrot.slane %v359_v31, 4  ;;  %vm643_vm11 = vcmask 572416  }
  0xaa   : > { %644 = vst.msk [vmem:[#allocation4 + $0x10] sm:$0xff] %vm643_vm11, %v1322_v0  ;;  %vm655_vm11 = vcmask 728648  }
  0xab   : > { %357 = vst.msk [vmem:[#allocation2 + $0x8] sm:$0xf] %vm356_vm12, %v354_v32  ;;  %vm649_vm12 = vcmask 285848  }
  0xac   : > { %363 = vst.msk [vmem:[#allocation2 + $0x8] sm:$0xf] %vm362_vm13, %v360_v33  ;;  %vm663_vm13 = vcmask 121856  }
  0xb0   : > { %v364_v34 = vld [vmem:[#allocation2] sm:$0xff] }
  0xb1   : > { %389 = vrot.lane.b32.xlu1 %v364_v34, %s1339_s10  ;;  %370 = vst [vmem:[#allocation3] sm:$0xf] %v364_v34  ;;  %374 = vrot.lane.b32.xlu0 %v364_v34, %s1340_s12  ;;  %v368_v35 = vcombine.high %v364_v34, %v364_v34 }
  0xb3   : > { %371 = vst [vmem:[#allocation3 + $0x8] sm:$0xf] %v368_v35  ;;  %v365_v36 = vld [vmem:[#allocation2 + $0x8] sm:$0xf] }
  0xb4   : > { %373 = vst.msk [vmem:[#allocation3 + $0x10] sm:$0xf] %vm372_vm14, %v365_v36 }
  0xb5   : > { %419 = vrot.lane.b32.xlu1 %v364_v34, %s1341_s13  ;;  %404 = vrot.lane.b32.xlu0 %v364_v34, %s1342_s14 }
  0xb8   : > { %v494_v59 = vld [vmem:[#allocation3] sm:$0xff] }
  0xb9   : > { %449 = vrot.lane.b32.xlu1 %v364_v34, %s1343_s15  ;;  %434 = vrot.lane.b32.xlu0 %v364_v34, %s1344_s16 }
  0xba   : > { %v495_v63 = vld [vmem:[#allocation3 + $0x8] sm:$0xff] }
  0xbb   : > { %v496_v57 = vld [vmem:[#allocation3 + $0x10] sm:$0xff] }
  0xbd   : > { %479 = vrot.lane.b32.xlu1 %v364_v34, %s1345_s17  ;;  %464 = vrot.lane.b32.xlu0 %v364_v34, %s1346_s23 }
  0xc1   : > { %376 = vrot.lane.b32.xlu0 %v368_v35, %s1340_s12  ;;  %378 = vrot.lane.b32.xlu1 %v365_v36, %s1340_s12 }
  0xc5   : > { %393 = vrot.lane.b32.xlu0 %v365_v36, %s1339_s10  ;;  %391 = vrot.lane.b32.xlu1 %v368_v35, %s1339_s10 }
  0xc9   : > { %408 = vrot.lane.b32.xlu0 %v365_v36, %s1342_s14  ;;  %406 = vrot.lane.b32.xlu1 %v368_v35, %s1342_s14 }
  0xcd   : > { %423 = vrot.lane.b32.xlu0 %v365_v36, %s1341_s13  ;;  %421 = vrot.lane.b32.xlu1 %v368_v35, %s1341_s13 }
  0xd1   : > { %438 = vrot.lane.b32.xlu0 %v365_v36, %s1344_s16  ;;  %436 = vrot.lane.b32.xlu1 %v368_v35, %s1344_s16 }
  0xd5   : > { %453 = vrot.lane.b32.xlu0 %v365_v36, %s1343_s15  ;;  %451 = vrot.lane.b32.xlu1 %v368_v35, %s1343_s15 }
  0xd9   : > { %468 = vrot.lane.b32.xlu0 %v365_v36, %s1346_s23  ;;  %466 = vrot.lane.b32.xlu1 %v368_v35, %s1346_s23 }
  0xdd   : > { %481 = vrot.lane.b32.xlu0 %v368_v35, %s1345_s17  ;;  %483 = vrot.lane.b32.xlu1 %v365_v36, %s1345_s17 }
  0xe1   : > { %540 = vperm.xlu0 %1256, %v537_v38  }
 0x123   : > { %v390_v39 = vpop.permute.xlu1 %389  ;;  %v375_v40 = vpop.permute.xlu0 %374 }
 0x127   : > { %v420_v41 = vpop.permute.xlu1 %419  ;;  %v405_v42 = vpop.permute.xlu0 %404 }
 0x12b   : > { %v1522_v43 = vpop.permute.xlu1 %449  ;;  %v435_v44 = vpop.permute.xlu0 %434 }
 0x12f   : > { %v1524_v45 = vpop.permute.xlu1 %479  ;;  %v1526_v46 = vpop.permute.xlu0 %464 }
 0x133   : > { %v379_v47 = vpop.permute.xlu1 %378  ;;  %v377_v48 = vpop.permute.xlu0 %376 }
 0x134   : > { %388 = vst.msk [vmem:[#allocation3 + $0x28] sm:$0xf] %vm372_vm14, %v379_v47  ;;  %v381_v49 = vsel %vm1764_vm0, %v375_v40, %v377_v48  ;;  %v382_v50 = vsel %vm1764_vm0, %v377_v48, %v379_v47  ;;  %vm661_vm0 = vcmask 1048568  }
 0x135   : > { %386 = vst [vmem:[#allocation3 + $0x18] sm:$0xf] %v381_v49  ;;  %387 = vst [vmem:[#allocation3 + $0x20] sm:$0xf] %v382_v50 }
 0x137   : > { %v392_v51 = vpop.permute.xlu1 %391  ;;  %v394_v52 = vpop.permute.xlu0 %393 }
 0x138   : > { %v396_v53 = vsel %vm1767_vm2, %v390_v39, %v392_v51  ;;  %v397_v54 = vsel %vm1767_vm2, %v392_v51, %v394_v52  ;;  %403 = vst.msk [vmem:[#allocation3 + $0x40] sm:$0xf] %vm372_vm14, %v394_v52  ;;  %vm676_vm2 = vcmask 564648  }
 0x139   : > { %401 = vst [vmem:[#allocation3 + $0x30] sm:$0xf] %v396_v53  ;;  %402 = vst [vmem:[#allocation3 + $0x38] sm:$0xf] %v397_v54 }
 0x13b   : > { %v407_v55 = vpop.permute.xlu1 %406  ;;  %v409_v56 = vpop.permute.xlu0 %408  ;;  %v499_v58 = vld [vmem:[#allocation3 + $0x28] sm:$0xff] }
 0x13c   : > { %v411_v60 = vsel %vm1766_vm3, %v405_v42, %v407_v55  ;;  %v412_v61 = vsel %vm1766_vm3, %v407_v55, %v409_v56  ;;  %418 = vst.msk [vmem:[#allocation3 + $0x58] sm:$0xf] %vm372_vm14, %v409_v56  ;;  %v523_v62 = vpack.c.bf16 %v499_v58, %v496_v57  ;;  %v498_v1 = vld [vmem:[#allocation3 + $0x20] sm:$0xff]  ;;  %v497_v2 = vld [vmem:[#allocation3 + $0x18] sm:$0xff]  ;;  %vm696_vm3 = vcmask 400648  }
 0x13d   : > { %416 = vst [vmem:[#allocation3 + $0x48] sm:$0xf] %v411_v60  ;;  %417 = vst [vmem:[#allocation3 + $0x50] sm:$0xf] %v412_v61  ;;  %v522_v3 = vpack.c.bf16 %v498_v1, %v495_v63  ;;  %v521_v4 = vpack.c.bf16 %v497_v2, %v494_v59  ;;  %v536_v61 = vld [vmem:[%s1753_s1] sm:$0xf] }
 0x13e   : > { %1151 = vmatpush3.bf16.msra.mxu1 %v523_v62 }
 0x13f   : > { %v422_v5 = vpop.permute.xlu1 %421  ;;  %557 = vmatprep.subr.bf16.mxu0 %v522_v3  ;;  %v424_v6 = vpop.permute.xlu0 %423  ;;  %1152 = vmatprep.subr.bf16.mxu1 %v1322_v0  ;;  %v502_v11 = vld [vmem:[#allocation3 + $0x40] sm:$0xff] }
 0x140   : > { %v426_v7 = vsel %vm1765_vm4, %v420_v41, %v422_v5  ;;  %v427_v8 = vsel %vm1765_vm4, %v422_v5, %v424_v6  ;;  %433 = vst.msk [vmem:[#allocation3 + $0x70] sm:$0xf] %vm372_vm14, %v424_v6  ;;  %558 = vmatpush1.bf16.msra.mxu0 %v521_v4  ;;  %v501_v13 = vld [vmem:[#allocation3 + $0x38] sm:$0xff]  ;;  %v500_v18 = vld [vmem:[#allocation3 + $0x30] sm:$0xff]  ;;  %vm674_vm4 = vcmask 417048  }
 0x141   : > { %431 = vst [vmem:[#allocation3 + $0x60] sm:$0xf] %v426_v7  ;;  %432 = vst [vmem:[#allocation3 + $0x68] sm:$0xf] %v427_v8 }
 0x143   : > { %v437_v9 = vpop.permute.xlu1 %436  ;;  %v439_v10 = vpop.permute.xlu0 %438  ;;  %v505_v12 = vld [vmem:[#allocation3 + $0x58] sm:$0xff] }
 0x144   : > { %v441_v14 = vsel %vm1763_vm5, %v435_v44, %v437_v9  ;;  %v442_v15 = vsel %vm1763_vm5, %v437_v9, %v439_v10  ;;  %448 = vst.msk [vmem:[#allocation3 + $0x88] sm:$0xf] %vm372_vm14, %v439_v10  ;;  %v526_v16 = vpack.c.bf16 %v505_v12, %v502_v11  ;;  %v504_v17 = vld [vmem:[#allocation3 + $0x50] sm:$0xff]  ;;  %v503_v19 = vld [vmem:[#allocation3 + $0x48] sm:$0xff]  ;;  %vm693_vm5 = vcmask 253048  }
 0x145   : > { %446 = vst [vmem:[#allocation3 + $0x78] sm:$0xf] %v441_v14  ;;  %447 = vst [vmem:[#allocation3 + $0x80] sm:$0xf] %v442_v15  ;;  %v525_v20 = vpack.c.bf16 %v504_v17, %v501_v13  ;;  %v524_v21 = vpack.c.bf16 %v503_v19, %v500_v18 }
 0x146   : > { %1153 = vmatpush3.bf16.msra.mxu1 %v526_v16 }
 0x147   : > { %v452_v22 = vpop.permute.xlu1 %451  ;;  %559 = vmatprep.subr.bf16.mxu0 %v525_v20  ;;  %v454_v23 = vpop.permute.xlu0 %453  ;;  %1154 = vmatprep.subr.bf16.mxu1 %v1322_v0  ;;  %v508_v28 = vld [vmem:[#allocation3 + $0x70] sm:$0xff] }
 0x148   : > { %v456_v24 = vsel %vm1762_vm6, %v1522_v43, %v452_v22  ;;  %v457_v25 = vsel %vm1762_vm6, %v452_v22, %v454_v23  ;;  %463 = vst.msk [vmem:[#allocation3 + $0xa0] sm:$0xf] %vm372_vm14, %v454_v23  ;;  %560 = vmatpush1.bf16.msra.mxu0 %v524_v21  ;;  %v507_v30 = vld [vmem:[#allocation3 + $0x68] sm:$0xff]  ;;  %v506_v35 = vld [vmem:[#allocation3 + $0x60] sm:$0xff]  ;;  %vm671_vm6 = vcmask 269448   ;;  %v862_v21 = vld [vmem:[%s1756_s4] sm:$0xff] }
 0x149   : > { %461 = vst [vmem:[#allocation3 + $0x90] sm:$0xf] %v456_v24  ;;  %462 = vst [vmem:[#allocation3 + $0x98] sm:$0xf] %v457_v25 }
 0x14b   : > { %v467_v26 = vpop.permute.xlu1 %466  ;;  %v469_v27 = vpop.permute.xlu0 %468  ;;  %v511_v29 = vld [vmem:[#allocation3 + $0x88] sm:$0xff] }
 0x14c   : > { %v471_v31 = vsel %vm1761_vm7, %v1526_v46, %v467_v26  ;;  %v472_v32 = vsel %vm1761_vm7, %v467_v26, %v469_v27  ;;  %478 = vst.msk [vmem:[#allocation3 + $0xb8] sm:$0xf] %vm372_vm14, %v469_v27  ;;  %v529_v33 = vpack.c.bf16 %v511_v29, %v508_v28  ;;  %v510_v34 = vld [vmem:[#allocation3 + $0x80] sm:$0xff]  ;;  %v509_v36 = vld [vmem:[#allocation3 + $0x78] sm:$0xff]  ;;  %vm659_vm7 = vcmask 1023848  }
 0x14d   : > { %476 = vst [vmem:[#allocation3 + $0xa8] sm:$0xf] %v471_v31  ;;  %477 = vst [vmem:[#allocation3 + $0xb0] sm:$0xf] %v472_v32  ;;  %v528_v38 = vpack.c.bf16 %v510_v34, %v507_v30  ;;  %v527_v39 = vpack.c.bf16 %v509_v36, %v506_v35 }
 0x14e   : > { %1155 = vmatpush3.bf16.msra.mxu1 %v529_v33 }
 0x14f   : > { %v484_v40 = vpop.permute.xlu1 %483  ;;  %561 = vmatprep.subr.bf16.mxu0 %v528_v38  ;;  %v482_v41 = vpop.permute.xlu0 %481  ;;  %1156 = vmatprep.subr.bf16.mxu1 %v1322_v0  ;;  %v514_v44 = vld [vmem:[#allocation3 + $0xa0] sm:$0xff] }
 0x150   : > { %493 = vst.msk [vmem:[#allocation3 + $0xd0] sm:$0xf] %vm372_vm14, %v484_v40  ;;  %v486_v42 = vsel %vm1760_vm8, %v1524_v45, %v482_v41  ;;  %v487_v43 = vsel %vm1760_vm8, %v482_v41, %v484_v40  ;;  %562 = vmatpush1.bf16.msra.mxu0 %v527_v39  ;;  %v513_v47 = vld [vmem:[#allocation3 + $0x98] sm:$0xff]  ;;  %v512_v50 = vld [vmem:[#allocation3 + $0x90] sm:$0xff]  ;;  %vm651_vm14 = vcmask 433448   ;;  %vm686_vm8 = vcmask 105472  }
 0x151   : > { %491 = vst [vmem:[#allocation3 + $0xc0] sm:$0xf] %v486_v42  ;;  %492 = vst [vmem:[#allocation3 + $0xc8] sm:$0xf] %v487_v43 }
 0x153   : > { %v517_v46 = vld [vmem:[#allocation3 + $0xb8] sm:$0xff] }
 0x154   : > { %v532_v48 = vpack.c.bf16 %v517_v46, %v514_v44  ;;  %v516_v49 = vld [vmem:[#allocation3 + $0xb0] sm:$0xff]  ;;  %v515_v51 = vld [vmem:[#allocation3 + $0xa8] sm:$0xff] }
 0x155   : > { %v531_v52 = vpack.c.bf16 %v516_v49, %v513_v47  ;;  %v530_v53 = vpack.c.bf16 %v515_v51, %v512_v50 }
 0x156   : > { %1157 = vmatpush3.bf16.msra.mxu1 %v532_v48 }
 0x157   : > { %563 = vmatprep.subr.bf16.mxu0 %v531_v52  ;;  %1158 = vmatprep.subr.bf16.mxu1 %v1322_v0  ;;  %v520_v45 = vld [vmem:[#allocation3 + $0xd0] sm:$0xff] }
 0x158   : > { %564 = vmatpush1.bf16.msra.mxu0 %v530_v53  ;;  %v519_v54 = vld [vmem:[#allocation3 + $0xc8] sm:$0xff]  ;;  %v535_v55 = vpack.c.bf16 %v520_v45, %v520_v45  ;;  %v518_v56 = vld [vmem:[#allocation3 + $0xc0] sm:$0xff] }
 0x159   : > { %v534_v57 = vpack.c.bf16 %v519_v54, %v519_v54  ;;  %v533_v58 = vpack.c.bf16 %v518_v56, %v518_v56 }
 0x15a   : > { %v555_v59 = vsel %vm1759_vm9, %v535_v55, 0 }
 0x15b   : > { %1125 = vmatprep.subr.msk.bf16.mxu0 %vm1759_vm9, %v534_v57  ;;  %1159 = vmatpush3.bf16.msra.mxu1 %v555_v59  ;;  %v549_v60 = vsel %vm1759_vm9, %v533_v58, 0  ;;  %vm668_vm9 = vcmask 154624  }
 0x15c   : > { %566 = vmatpush1.bf16.msra.mxu0 %v549_v60  ;;  %1164 = vmatprep.subr.bf16.mxu1 %v1322_v0 }
 0x15e   : > { %1161 = vmatmul.mubr.msk.bf16.vlgmr.msra.gmra.mrb[0].mxu1 %vm1758_vm10, %v536_v61 }
 0x15f   : > { %1126 = vmatmul.mubr.msk.bf16.vlgmr.msra.gmra.mrb[0].mxu0 %vm1758_vm10, %v536_v61  ;;  %1174 = vmatprep.mubr.msk.bf16.mxu1 %vm1348_vm15, %v1322_v0  ;;  %vm653_vm15 = vcmask 581048   ;;  %vm657_vm10 = vcmask 876248  }
 0x160   : > { %912 = vmatprep.mubr.bf16.mxu0 %v1347_v37  ;;  %v541_v62 = vpop.permute.xlu0 %540 }
 0x231   : > { %v632_v63 = vpop.f32.mrb[0].mxu1 }
 0x232   : > { %v591_v1 = vpop.f32.mrb[0].mxu0  ;;  %v633_v2 = vadd.f32 %v632_v63, %v541_v62  ;;  %v1162_v3 = vpop.f32.mrb[1].mxu1 }
 0x233   : > { %v592_v4 = vadd.f32 %v591_v1, %v541_v62  ;;  %v593_v5 = vpop.f32.mrb[1].mxu0  ;;  %v635_v6 = vpop.f32.mrb[2].mxu1 }
 0x234   : > { %v595_v7 = vpop.f32.mrb[2].mxu0  ;;  %v1163_v8 = vpop.f32.mrb[3].mxu1  ;;  %v640_v9 = vmax.f32 %v633_v2, 0.0  ;;  %v594_v10 = vadd.f32 %v593_v5, %v541_v62 }
 0x235   : > { %v596_v11 = vpop.f32.mrb[3].mxu0  ;;  %v638_v12 = vmax.f32 %v592_v4, 0.0 }
 0x236   : > { %689 = vrot.lane.b32.xlu0 %v640_v9, %s1324_s11  ;;  %v639_v37 = vmax.f32 %v594_v10, 0.0 }
 0x237   : > { %646 = vrot.lane.b32.xlu1 %v638_v12, %s1324_s11 }
 0x23b   : > { %666 = vrot.lane.b32.xlu1 %v639_v37, %s1324_s11  ;;  %s1356_s11 = smov 116  }
 0x2a8   : > { %v690_v14 = vpop.permute.xlu0 %689 }
 0x2a9   : > { %v647_v13 = vpop.permute.xlu1 %646 }
 0x2aa   : > { %650 = vst.msk [vmem:[#allocation4] sm:$0xff] %vm649_vm12, %v647_v13  ;;  %vm678_vm12 = vcmask 712248  }
 0x2ab   : > { %664 = vst.msk [vmem:[#allocation4 + $0x8] sm:$0xff] %vm663_vm13, %v647_v13  ;;  %vm680_vm13 = vcmask 859848  }
 0x2ac   : > { %652 = vst.msk [vmem:[#allocation4] sm:$0xff] %vm651_vm14, %v647_v13  ;;  %vm682_vm14 = vcmask 1007448  }
 0x2ad   : > { %654 = vst.msk [vmem:[#allocation4] sm:$0xff] %vm653_vm15, %v647_v13  ;;  %v667_v15 = vpop.permute.xlu1 %666  ;;  %vm684_vm15 = vcmask 1048552  }
 0x2ae   : > { %656 = vst.msk [vmem:[#allocation4] sm:$0xff] %vm655_vm11, %v647_v13  ;;  %v669_v16 = vsel %vm668_vm9, %v647_v13, %v667_v15  ;;  %v691_v17 = vsel %vm668_vm9, %v667_v15, %v690_v14  ;;  %vm1778_vm9 = vcmask 883712   ;;  %vm1780_vm11 = vcmask 752640  }
 0x2af   : > { %658 = vst.msk [vmem:[#allocation4] sm:$0xff] %vm657_vm10, %v647_v13  ;;  %vm1779_vm10 = vmmov %vm1778_vm9 }
 0x2b0   : > { %687 = vst.msk [vmem:[#allocation4 + $0x10] sm:$0xff] %vm686_vm8, %v667_v15 }
 0x2b1   : > { %660 = vst.msk [vmem:[#allocation4] sm:$0xff] %vm659_vm7, %v647_v13  ;;  %vm1776_vm7 = vcmask 1039360  }
 0x2b2   : > { %672 = vst.msk [vmem:[#allocation4 + $0x8] sm:$0xff] %vm671_vm6, %v669_v16  ;;  %vm1777_vm8 = vmmov %vm1776_vm7 }
 0x2b3   : > { %694 = vst.msk [vmem:[#allocation4 + $0x10] sm:$0xff] %vm693_vm5, %v691_v17  ;;  %vm1774_vm5 = vcmask 891904  }
 0x2b4   : > { %662 = vst.msk [vmem:[#allocation4] sm:$0xff] %vm661_vm0, %v647_v13  ;;  %vm1770_vm0 = vcmask 1031168   ;;  %vm1775_vm6 = vmmov %vm1774_vm5 }
 0x2b5   : > { %675 = vst.msk [vmem:[#allocation4 + $0x8] sm:$0xff] %vm674_vm4, %v667_v15 }
 0x2b6   : > { %697 = vst.msk [vmem:[#allocation4 + $0x10] sm:$0xff] %vm696_vm3, %v690_v14  ;;  %vm1772_vm3 = vcmask 900096  }
 0x2b7   : > { %677 = vst.msk [vmem:[#allocation4 + $0x8] sm:$0xff] %vm676_vm2, %v667_v15  ;;  %vm1771_vm2 = vmmov %vm1770_vm0 }
 0x2b8   : > { %679 = vst.msk [vmem:[#allocation4 + $0x8] sm:$0xff] %vm678_vm12, %v667_v15  ;;  %vm1773_vm4 = vmmov %vm1772_vm3 }
 0x2b9   : > { %681 = vst.msk [vmem:[#allocation4 + $0x8] sm:$0xff] %vm680_vm13, %v667_v15  ;;  %vm1781_vm12 = vmmov %vm1780_vm11  ;;  %vm1782_vm13 = vcmask 744448  }
 0x2ba   : > { %683 = vst.msk [vmem:[#allocation4 + $0x8] sm:$0xff] %vm682_vm14, %v667_v15  ;;  %vm1783_vm14 = vmmov %vm1782_vm13 }
 0x2bb   : > { %685 = vst.msk [vmem:[#allocation4 + $0x8] sm:$0xff] %vm684_vm15, %v667_v15  ;;  %v1577_v19 = vld [vmem:[#allocation4] sm:$0xff]  ;;  %vm1784_vm15 = vcmask 736256  }
 0x2bd   : > { %v700_v18 = vld [vmem:[#allocation4 + $0x10] sm:$0xff] }
 0x2be   : > { %725 = vrot.lane.b32.xlu1 %v700_v18, %s1339_s10  ;;  %703 = vst.msk [vmem:[#allocation5 + $0x10] sm:$0xff] %vm229_vm1, %v700_v18  ;;  %711 = vrot.lane.b32.xlu0 %v700_v18, %s1340_s12 }
 0x2c2   : > { %739 = vrot.lane.b32.xlu1 %v700_v18, %s1342_s14  ;;  %721 = vrot.lane.b32.xlu0 %v1577_v19, %s1339_s10  ;;  %v1585_v20 = vld [vmem:[#allocation4 + $0x8] sm:$0xff] }
 0x2c5   : > { %v821_v28 = vld [vmem:[#allocation5 + $0x10] sm:$0xff] }
 0x2c6   : > { %753 = vrot.lane.b32.xlu1 %v700_v18, %s1341_s13  ;;  %749 = vrot.lane.b32.xlu0 %v1577_v19, %s1341_s13 }
 0x2ca   : > { %767 = vrot.lane.b32.xlu1 %v700_v18, %s1344_s16  ;;  %777 = vrot.lane.b32.xlu0 %v1577_v19, %s1343_s15 }
 0x2ce   : > { %707 = vrot.lane.b32.xlu1 %v1577_v19, %s1340_s12  ;;  %805 = vrot.lane.b32.xlu0 %v1577_v19, %s1345_s17 }
 0x2d2   : > { %735 = vrot.lane.b32.xlu1 %v1577_v19, %s1342_s14  ;;  %723 = vrot.lane.b32.xlu0 %v1585_v20, %s1339_s10 }
 0x2d6   : > { %763 = vrot.lane.b32.xlu1 %v1577_v19, %s1344_s16  ;;  %737 = vrot.lane.b32.xlu0 %v1585_v20, %s1342_s14 }
 0x2da   : > { %751 = vrot.lane.b32.xlu0 %v1585_v20, %s1341_s13  ;;  %709 = vrot.lane.b32.xlu1 %v1585_v20, %s1340_s12  ;;  %s215_s12 = sand.u32 1, %s1312_s19  }
 0x2db   : > { %s1122_s13 = sshll.u32 %s215_s12, 4 }
 0x2de   : > { %765 = vrot.lane.b32.xlu0 %v1585_v20, %s1344_s16  ;;  %781 = vrot.lane.b32.xlu1 %v700_v18, %s1343_s15 }
 0x2e2   : > { %779 = vrot.lane.b32.xlu0 %v1585_v20, %s1343_s15  ;;  %795 = vrot.lane.b32.xlu1 %v700_v18, %s1346_s23  ;;  %s1667_s15 = scalar_lea.vmem [#allocation6], %s1122_s13  ;;  %s1360_s13 = smov 98  }
 0x2e6   : > { %793 = vrot.lane.b32.xlu0 %v1585_v20, %s1346_s23  ;;  %791 = vrot.lane.b32.xlu1 %v1577_v19, %s1346_s23  ;;  %s1350_s23 = smov 100  }
 0x2ea   : > { %809 = vrot.lane.b32.xlu0 %v700_v18, %s1345_s17  ;;  %807 = vrot.lane.b32.xlu1 %v1585_v20, %s1345_s17  ;;  %s1349_s17 = smov 124  }
 0x2ee   : > { %865 = vperm.xlu1 %1257, %v862_v21  }
 0x330   : > { %v726_v22 = vpop.permute.xlu1 %725  ;;  %v712_v23 = vpop.permute.xlu0 %711 }
 0x331   : > { %734 = vst.msk [vmem:[#allocation5 + $0x40] sm:$0xff] %vm229_vm1, %v726_v22  ;;  %720 = vst.msk [vmem:[#allocation5 + $0x28] sm:$0xff] %vm229_vm1, %v712_v23 }
 0x334   : > { %v740_v24 = vpop.permute.xlu1 %739  ;;  %v722_v25 = vpop.permute.xlu0 %721 }
 0x335   : > { %748 = vst.msk [vmem:[#allocation5 + $0x58] sm:$0xff] %vm229_vm1, %v740_v24 }
 0x338   : > { %v754_v26 = vpop.permute.xlu1 %753  ;;  %v750_v27 = vpop.permute.xlu0 %749  ;;  %v824_v29 = vld [vmem:[#allocation5 + $0x28] sm:$0xff]  ;;  %v827_v33 = vld [vmem:[#allocation5 + $0x40] sm:$0xff] }
 0x339   : > { %762 = vst.msk [vmem:[#allocation5 + $0x70] sm:$0xff] %vm229_vm1, %v754_v26  ;;  %v848_v30 = vpack.c.bf16 %v824_v29, %v821_v28 }
 0x33b   : > { %1165 = vmatpush3.bf16.msra.mxu1 %v848_v30 }
 0x33c   : > { %v768_v31 = vpop.permute.xlu1 %767  ;;  %v778_v32 = vpop.permute.xlu0 %777  ;;  %1166 = vmatprep.subr.bf16.mxu1 %v1322_v0  ;;  %v830_v34 = vld [vmem:[#allocation5 + $0x58] sm:$0xff] }
 0x33d   : > { %776 = vst.msk [vmem:[#allocation5 + $0x88] sm:$0xff] %vm229_vm1, %v768_v31  ;;  %v851_v35 = vpack.c.bf16 %v830_v34, %v827_v33 }
 0x33f   : > { %1167 = vmatpush3.bf16.msra.mxu1 %v851_v35 }
 0x340   : > { %v708_v36 = vpop.permute.xlu1 %707  ;;  %v806_v38 = vpop.permute.xlu0 %805  ;;  %1168 = vmatprep.subr.bf16.mxu1 %v1322_v0  ;;  %v833_v41 = vld [vmem:[#allocation5 + $0x70] sm:$0xff] }
 0x344   : > { %v736_v39 = vpop.permute.xlu1 %735  ;;  %v724_v40 = vpop.permute.xlu0 %723  ;;  %v836_v42 = vld [vmem:[#allocation5 + $0x88] sm:$0xff] }
 0x345   : > { %v727_v43 = vsel %vm1770_vm0, %v722_v25, %v724_v40  ;;  %v728_v44 = vsel %vm1771_vm2, %v724_v40, %v726_v22  ;;  %v854_v46 = vpack.c.bf16 %v836_v42, %v833_v41  ;;  %vm1785_vm0 = vmmov %vm1784_vm15  ;;  %vm1786_vm2 = vcmask 1043456   ;;  %v861_v22 = vld [vmem:[%s1755_s3] sm:$0xf] }
 0x347   : > { %1169 = vmatpush3.bf16.msra.mxu1 %v854_v46 }
 0x348   : > { %v764_v47 = vpop.permute.xlu1 %763  ;;  %v738_v48 = vpop.permute.xlu0 %737  ;;  %1170 = vmatprep.subr.bf16.mxu1 %v1322_v0 }
 0x349   : > { %v741_v49 = vsel %vm1772_vm3, %v736_v39, %v738_v48  ;;  %v742_v50 = vsel %vm1773_vm4, %v738_v48, %v740_v24  ;;  %vm1787_vm3 = vmmov %vm1786_vm2 }
 0x34a   : > { %v850_v60 = vpack.c.bf16 %v742_v50, %v728_v44  ;;  %v849_v63 = vpack.c.bf16 %v741_v49, %v727_v43  ;;  %vm1789_vm4 = vmmov %vm1786_vm2 }
 0x34c   : > { %v752_v51 = vpop.permute.xlu0 %751  ;;  %v710_v52 = vpop.permute.xlu1 %709 }
 0x34d   : > { %v755_v53 = vsel %vm1774_vm5, %v750_v27, %v752_v51  ;;  %v756_v45 = vsel %vm1775_vm6, %v752_v51, %v754_v26  ;;  %v713_v54 = vsel %vm1776_vm7, %v708_v36, %v710_v52  ;;  %v714_v55 = vsel %vm1777_vm8, %v710_v52, %v712_v23 }
 0x34e   : > { %v847_v56 = vpack.c.bf16 %v714_v55, %v1585_v20  ;;  %v846_v57 = vpack.c.bf16 %v713_v54, %v1577_v19  ;;  %vm964_vm6 = vcmask 130048   ;;  %vm970_vm7 = vcmask 261248  }
 0x34f   : > { %vm975_vm8 = vcmask 392448  }
 0x350   : > { %v766_v58 = vpop.permute.xlu0 %765  ;;  %v782_v59 = vpop.permute.xlu1 %781  ;;  %880 = vmatprep.subr.bf16.mxu0 %v847_v56 }
 0x351   : > { %v769_v61 = vsel %vm1778_vm9, %v764_v47, %v766_v58  ;;  %v770_v62 = vsel %vm1779_vm10, %v766_v58, %v768_v31  ;;  %790 = vst.msk [vmem:[#allocation5 + $0xa0] sm:$0xff] %vm229_vm1, %v782_v59  ;;  %881 = vmatpush1.bf16.msra.mxu0 %v846_v57  ;;  %vm980_vm9 = vcmask 523648   ;;  %vm985_vm10 = vcmask 654848  }
 0x352   : > { %882 = vmatprep.subr.bf16.mxu0 %v850_v60  ;;  %v853_v3 = vpack.c.bf16 %v770_v62, %v756_v45  ;;  %v852_v6 = vpack.c.bf16 %v769_v61, %v755_v53 }
 0x354   : > { %v780_v1 = vpop.permute.xlu0 %779  ;;  %v796_v2 = vpop.permute.xlu1 %795 }
 0x355   : > { %v783_v4 = vsel %vm1780_vm11, %v778_v32, %v780_v1  ;;  %v784_v5 = vsel %vm1781_vm12, %v780_v1, %v782_v59  ;;  %804 = vst.msk [vmem:[#allocation5 + $0xb8] sm:$0xff] %vm229_vm1, %v796_v2  ;;  %883 = vmatpush1.bf16.msra.mxu0 %v849_v63  ;;  %vm990_vm11 = vcmask 786048   ;;  %vm995_vm12 = vcmask 917248  }
 0x356   : > { %884 = vmatprep.subr.bf16.mxu0 %v853_v3 }
 0x358   : > { %v794_v7 = vpop.permute.xlu0 %793  ;;  %v792_v8 = vpop.permute.xlu1 %791  ;;  %v839_v14 = vld [vmem:[#allocation5 + $0xa0] sm:$0xff] }
 0x359   : > { %v798_v9 = vsel %vm1782_vm13, %v794_v7, %v796_v2  ;;  %v797_v10 = vsel %vm1783_vm14, %v792_v8, %v794_v7  ;;  %885 = vmatpush1.bf16.msra.mxu0 %v852_v6  ;;  %vm1002_vm13 = vcmask 932864   ;;  %vm1005_vm14 = vcmask 1048448  }
 0x35a   : > { %v856_v11 = vpack.c.bf16 %v798_v9, %v784_v5  ;;  %v855_v12 = vpack.c.bf16 %v797_v10, %v783_v4 }
 0x35c   : > { %v810_v37 = vpop.permute.xlu0 %809  ;;  %v808_v13 = vpop.permute.xlu1 %807  ;;  %v842_v15 = vld [vmem:[#allocation5 + $0xb8] sm:$0xff]  ;;  %886 = vmatprep.subr.bf16.mxu0 %v856_v11 }
 0x35d   : > { %818 = vst.msk [vmem:[#allocation5 + $0xd0] sm:$0xff] %vm229_vm1, %v810_v37  ;;  %v811_v16 = vsel %vm1784_vm15, %v806_v38, %v808_v13  ;;  %v812_v17 = vsel %vm1785_vm0, %v808_v13, %v810_v37  ;;  %v857_v18 = vpack.c.bf16 %v842_v15, %v839_v14  ;;  %887 = vmatpush1.bf16.msra.mxu0 %v855_v12  ;;  %vm1788_vm1 = vcmask 588800  }
 0x35e   : > { %v859_v19 = vpack.c.bf16 %v812_v17, %v812_v17  ;;  %v858_v20 = vpack.c.bf16 %v811_v16, %v811_v16  ;;  %vm1790_vm5 = vmmov %vm1788_vm1  ;;  %vm1036_vm15 = vcmask 818176  }
 0x35f   : > { %1171 = vmatpush3.bf16.msra.mxu1 %v857_v18 }
 0x360   : > { %1172 = vmatprep.subr.bf16.mxu1 %v1322_v0  ;;  %1128 = vmatprep.subr.msk.bf16.mxu0 %vm1786_vm2, %v859_v19  ;;  %v872_v21 = vsel %vm1787_vm3, %v858_v20, 0 }
 0x361   : > { %889 = vmatpush1.bf16.msra.mxu0 %v872_v21 }
 0x364   : > { %v845_v23 = vld [vmem:[#allocation5 + $0xd0] sm:$0xff]  ;;  %1129 = vmatmul.mubr.msk.bf16.vlgmr.msra.gmra.mrb[4].mxu0 %vm1788_vm1, %v861_v22 }
 0x365   : > { %v860_v24 = vpack.c.bf16 %v845_v23, %v845_v23 }
 0x367   : > { %v878_v25 = vsel %vm1789_vm4, %v860_v24, 0 }
 0x368   : > { %1173 = vmatpush3.bf16.msra.mxu1 %v878_v25 }
 0x36b   : > { %1175 = vmatmul.mubr.msk.bf16.vlgmr.msra.gmra.mrb[4].mxu1 %vm1790_vm5, %v861_v22 }
 0x36d   : > { %v866_v0 = vpop.permute.xlu1 %865 }
 0x437   : > { %v914_v26 = vpop.f32.mrb[4].mxu0 }
 0x438   : > { %v915_v27 = vadd.f32 %v914_v26, %v866_v0  ;;  %v916_v28 = vpop.f32.mrb[5].mxu0 }
 0x439   : > { %v918_v29 = vpop.f32.mrb[6].mxu0  ;;  %v917_v39 = vadd.f32 %v916_v28, %v866_v0 }
 0x43a   : > { %v961_v30 = vmax.f32 %v915_v27, 0.0  ;;  %v919_v31 = vpop.f32.mrb[7].mxu0 }
 0x43b   : > { %v962_v40 = vmax.f32 %v917_v39, 0.0 }
 0x43c   : > { %967 = vrot.lane.b32.xlu1 %v961_v30, %s1339_s10  ;;  %965 = vst.msk [vmem:[%s1667_s15] sm:$0xff] %vm964_vm6, %v961_v30  ;;  %s1353_s10 = smov 120  }
 0x43e   : > { %v955_v32 = vpop.f32.mrb[4].mxu1 }
 0x43f   : > { %v956_v33 = vadd.f32 %v955_v32, %v866_v0  ;;  %v1176_v34 = vpop.f32.mrb[5].mxu1 }
 0x440   : > { %v958_v35 = vpop.f32.mrb[6].mxu1  ;;  %972 = vrot.lane.b32.xlu1 %v961_v30, %s1349_s17 }
 0x441   : > { %v1177_v36 = vpop.f32.mrb[7].mxu1  ;;  %v963_v38 = vmax.f32 %v956_v33, 0.0 }
 0x443   : > { %1034 = vrot.lane.b32.xlu0 %v963_v38, %s1350_s23 }
 0x444   : > { %977 = vrot.lane.b32.xlu1 %v961_v30, %s1351_s25 }
 0x447   : > { %998 = vrot.lane.b32.xlu0 %v961_v30, %s1352_s26 }
 0x448   : > { %982 = vrot.lane.b32.xlu1 %v961_v30, %s1353_s10  ;;  %s1361_s10 = smov [#allocation6]  }
 0x44b   : > { %1007 = vrot.lane.b32.xlu0 %v962_v40, %s1354_s30  ;;  %s1262_s30 = sshll.u32 %s1361_s10, 4  ;;  %s1263_s30 = int_to_ptr.vmem [resolvable:$false] %s1262_s30 }
 0x44c   : > { %987 = vrot.lane.b32.xlu1 %v961_v30, %s1355_s6  ;;  %s1264_s6 = scalar_lea.vmem %s1263_s30, 512 }
 0x44f   : > { %1011 = vrot.lane.b32.xlu0 %v962_v40, %s1342_s14  ;;  %s1137_s14 = sshll.u32 %s1413_s22, 8  ;;  %s1045_s22 = scalar_lea.sflag [#allocation7], %s215_s12 }
 0x450   : > { %992 = vrot.lane.b32.xlu1 %v961_v30, %s1356_s11  ;;  %s1706_s25 = scalar_lea.hbm %s1757_s5, %s1137_s14 }
 0x453   : > { %1015 = vrot.lane.b32.xlu0 %v962_v40, %s1344_s16  ;;  %s1059_s16 = sshll.u32 %s1667_s15, 4  ;;  %s1708_s16 = int_to_ptr.vmem [resolvable:$true] %s1059_s16 }
 0x454   : > { %1032 = vrot.lane.b32.xlu1 %v962_v40, %s1350_s23  ;;  %p1265_p0 = scmp.lt.s32.totalorder %s1708_s16, %s1263_s30 }
 0x457   : > { %1019 = vrot.lane.b32.xlu0 %v962_v40, %s1357_s7 }
 0x458   : > { %1000 = vrot.lane.b32.xlu1 %v962_v40, %s1352_s26  ;;  %s1258_s26 = scalar_lea.vmem %s1708_s16, 256 }
 0x459   : > { %p1259_p11 = scmp.ne.s32.totalorder %s1708_s16, %s1258_s26  ;;  %p1266_p1 = scmp.lt.s32.totalorder %s1264_s6, %s1258_s26 }
 0x45b   : > { %1023 = vrot.lane.b32.xlu0 %v962_v40, %s1358_s8  ;;  %p1260_p12 = pnand %p1259_p11, %p1430_p5  ;;  %p1267_p2 = por %p1266_p1, %p1265_p0 }
 0x45d   : > { %p1261_p13 = pneg %p1260_p12 }
 0x45f   : > { %1027 = vrot.lane.b32.xlu0 %v962_v40, %s1359_s9  ;;  %p1268_p3 = pnand %p1267_p2, %p1261_p13 }
 0x463   : > { %1040 = vrot.lane.b32.xlu0 %v963_v38, %s1360_s13 }
 0x4ae   : > { %v968_v41 = vpop.permute.xlu1 %967 }
 0x4af   : > { %971 = vst.msk [vmem:[%s1667_s15] sm:$0xff] %vm970_vm7, %v968_v41 }
 0x4b2   : > { %v973_v42 = vpop.permute.xlu1 %972 }
 0x4b3   : > { %976 = vst.msk [vmem:[%s1667_s15] sm:$0xff] %vm975_vm8, %v973_v42 }
 0x4b5   : > { %v1035_v43 = vpop.permute.xlu0 %1034 }
 0x4b6   : > { %v978_v44 = vpop.permute.xlu1 %977 }
 0x4b7   : > { %981 = vst.msk [vmem:[%s1667_s15] sm:$0xff] %vm980_vm9, %v978_v44 }
 0x4b9   : > { %v999_v46 = vpop.permute.xlu0 %998 }
 0x4ba   : > { %v983_v47 = vpop.permute.xlu1 %982 }
 0x4bb   : > { %986 = vst.msk [vmem:[%s1667_s15] sm:$0xff] %vm985_vm10, %v983_v47 }
 0x4bd   : > { %v1008_v48 = vpop.permute.xlu0 %1007 }
 0x4be   : > { %1010 = vst.msk [vmem:[%s1667_s15 + $0x8] sm:$0xff] %vm964_vm6, %v1008_v48  ;;  %v988_v49 = vpop.permute.xlu1 %987 }
 0x4bf   : > { %991 = vst.msk [vmem:[%s1667_s15] sm:$0xff] %vm990_vm11, %v988_v49 }
 0x4c1   : > { %v1012_v50 = vpop.permute.xlu0 %1011 }
 0x4c2   : > { %1014 = vst.msk [vmem:[%s1667_s15 + $0x8] sm:$0xff] %vm970_vm7, %v1012_v50  ;;  %v993_v51 = vpop.permute.xlu1 %992 }
 0x4c3   : > { %996 = vst.msk [vmem:[%s1667_s15] sm:$0xff] %vm995_vm12, %v993_v51 }
 0x4c5   : > { %v1016_v52 = vpop.permute.xlu0 %1015 }
 0x4c6   : > { %1018 = vst.msk [vmem:[%s1667_s15 + $0x8] sm:$0xff] %vm975_vm8, %v1016_v52  ;;  %v1033_v53 = vpop.permute.xlu1 %1032 }
 0x4c7   : > { %v1037_v58 = vsel %vm1036_vm15, %v1033_v53, %v1035_v43 }
 0x4c9   : > { %v1020_v45 = vpop.permute.xlu0 %1019 }
 0x4ca   : > { %1022 = vst.msk [vmem:[%s1667_s15 + $0x8] sm:$0xff] %vm980_vm9, %v1020_v45  ;;  %v1001_v54 = vpop.permute.xlu1 %1000 }
 0x4cb   : > { %v1003_v55 = vsel %vm1002_vm13, %v999_v46, %v1001_v54 }
 0x4cc   : > { %1006 = vst.msk [vmem:[%s1667_s15] sm:$0xff] %vm1005_vm14, %v1003_v55 }
 0x4cd   : > { %v1024_v56 = vpop.permute.xlu0 %1023 }
 0x4ce   : > { %1026 = vst.msk [vmem:[%s1667_s15 + $0x8] sm:$0xff] %vm985_vm10, %v1024_v56 }
 0x4d1   : > { %v1028_v57 = vpop.permute.xlu0 %1027 }
 0x4d2   : > { %1030 = vst.msk [vmem:[%s1667_s15 + $0x8] sm:$0xff] %vm990_vm11, %v1028_v57 }
 0x4d3   : > { %1039 = vst.msk [vmem:[%s1667_s15 + $0x8] sm:$0xff] %vm995_vm12, %v1037_v58 }
 0x4d5   : > { %v1041_v59 = vpop.permute.xlu0 %1040 }
 0x4d6   : > { %1043 = vst.msk [vmem:[%s1667_s15 + $0x8] sm:$0xff] %vm1005_vm14, %v1041_v59 }
 0x4d7   : > { %1271 = shalt.err (!%p1268_p3)
}
 0x4d8   : > { %s1272_s12 = scalar_lea.hbm %s1706_s25, 256  ;;  %s1276_s7 = scalar_lea.hbm %s1757_s5, 512 }
 0x4d9   : > { %p1273_p4 = scmp.ne.s32.totalorder %s1706_s25, %s1272_s12  ;;  %p1277_p9 = scmp.lt.u32.totalorder %s1706_s25, %s1757_s5 }
 0x4da   : > { %p1278_p10 = scmp.lt.u32.totalorder %s1276_s7, %s1272_s12  ;;  %p1280_p12 = scmp.lt.u32.totalorder %s1272_s12, %s1706_s25 }
 0x4db   : > { %p1274_p7 = pnand %p1273_p4, %p1430_p5 }
 0x4dc   : > { %p1279_p11 = por %p1278_p10, %p1277_p9 }
 0x4dd   : > { %p1275_p8 = pneg %p1274_p7 }
 0x4de   : > { %p1281_p13 = por %p1280_p12, %p1279_p11 }
 0x4e0   : > { %p1282_p0 = pnand %p1281_p13, %p1275_p8 }
 0x4e2   : > { %1285 = shalt.err (!%p1282_p0)
}
 0x4e3   : > { %1178 = dma.vmem_to_hbm [thread:$0]  (%p1430_p5), %s1708_s16, 256, %s1706_s25, %s1045_s22  }
 0x4e4 PF: > { %p1184_p1 = scmp.ge.s32.totalorder %s1320_s21, 2  ;;  %s1071_s13 = sand.u32 1, %s1308_s18  }
 0x4e5   : > { %s1072_s14 = scalar_lea.sflag [#allocation7], %s1071_s13 }
 0x4e6   : > { %p1181_p2 = pnand %p1184_p1, %p1434_p6 }
 0x4e8   : > { %1303 = dma.done.wait (!%p1181_p2), %s1072_s14, 256  }
 0x4e9   : > { %1305 = vsyncadd (!%p1181_p2), %s1072_s14, 4294967040  ;;  %p15_p3 = scmp.ge.s32.totalorder %s1417_s24, 4   ;;  %s1791_s18 = smov %s1312_s19 }
 0x4ea   : > { %s1792_s19 = smov %s1316_s20  ;;  %s1793_s20 = smov %s1428_s27 }
 0x4eb   : > { %s1794_s21 = smov %s1417_s24  ;;  %17 = sbr.rel (!%p15_p3) target bundleno = 3 (0x3), region = 75 }
 0x4f2   :  { %1077 = vsyncpa [#allocation7], 1 }
 0x4f3   :  { %1079 = vsyncpa [#allocation7 + $0x1], 1 }

</bundles_post_ra>
